<compile_context>
chip_gen: v6e
topology: v6e:2x2x1
jax: 0.10.0
libtpu: 0.0.40
codegen_flags: <defaults>
</compile_context>

<pallas_src>
import jax
import jax.numpy as jnp
from jax import lax
from jax.experimental import pallas as pl
from jax.experimental.pallas import tpu as pltpu

INPUT_SIZE = 1
HIDDEN = 32


def _make_lstm_kernel(T, T_BLOCK, B, needs_mask):
    """Build the recurrent kernel (T, T_BLOCK, B are static Python ints)."""
    H = HIDDEN

    def kernel(x_smem, wih_ref, bias_ref, whh_ref, wout_ref, bout_ref,
               h0_ref, c0_ref,
               y_ref, hn_ref, cn_ref,
               h_scr, c_scr, hblk_scr):
        g = pl.program_id(0)

        # Initialize the recurrent carry (VMEM scratch) on the first block.
        @pl.when(g == 0)
        def _():
            h_scr[...] = h0_ref[...]
            c_scr[...] = c0_ref[...]

        # Loop-invariant operands hoisted out of the recurrence.
        whh = whh_ref[...]            # [H, 4H]
        wih = wih_ref[...]            # [1, 4H]
        bias = bias_ref[...]          # [1, 4H] (b_ih + b_hh merged)
        base = g * (T_BLOCK * B)      # global row offset of this block in x

        def body(i, carry):
            h_prev, c_prev = carry

            # Fused input projection: x_t @ W_ih == scalar * [1,4H] row per
            # batch element.  Scalar SMEM loads + VPU splat-muls; independent
            # of h_prev, so this hides under the serial recurrence.
            rows = [x_smem[base + i * B + b] * wih for b in range(B)]
            xg = rows[0] if B == 1 else jnp.concatenate(rows, axis=0)  # [B,4H]

            gates = xg + bias + jnp.dot(h_prev, whh,
                                        preferred_element_type=jnp.float32)

            # 3 EUP pushes instead of 5: activations on the full-width gates
            # vreg, then 32-lane slices (PyTorch gate order: i, f, g, o).
            sig = jax.nn.sigmoid(gates)
            th = jnp.tanh(gates)
            i_g = sig[:, 0 * H:1 * H]
            f_g = sig[:, 1 * H:2 * H]
            o_g = sig[:, 3 * H:4 * H]
            g_g = th[:, 2 * H:3 * H]

            c_new = f_g * c_prev + i_g * g_g
            h_new = o_g * jnp.tanh(c_new)

            if needs_mask:
                # Tail block: freeze the carry on padded steps (t >= T).
                valid = (g * T_BLOCK + i) < T
                h_new = jnp.where(valid, h_new, h_prev)
                c_new = jnp.where(valid, c_new, c_prev)

            hblk_scr[i] = h_new        # hidden trajectory; off the h->h chain
            return h_new, c_new

        h, c = lax.fori_loop(0, T_BLOCK, body, (h_scr[...], c_scr[...]),
                             unroll=min(T_BLOCK, 16))
        h_scr[...] = h
        c_scr[...] = c

        # Fused output Linear(32 -> 1): one batched VPU multiply + lane (XLU)
        # reduction per block over the VMEM-resident hidden trajectory.  Only
        # the tiny [T_BLOCK, B, 1] result is written back to HBM.
        h_all = hblk_scr[...]                                   # [T_BLOCK,B,H]
        y = jnp.sum(h_all * wout_ref[...], axis=-1, keepdims=True)
        y_ref[...] = y + bout_ref[...]

        # Final states: written once, on the last (sequential) block.
        @pl.when(g == pl.num_programs(0) - 1)
        def _():
            hn_ref[...] = h
            cn_ref[...] = c

    return kernel


def rnn_forward(x, params, h_state=None, t_block_cap=512):
    """Pallas equivalent of RNN.forward(x, h_state).

    x       : [B, T, INPUT_SIZE]  float32 (batch_first, like PyTorch)
    h_state : None or tuple (h0, c0) each [1, B, HIDDEN]
    returns : (outs [B, T, 1], (h_n [1, B, HIDDEN], c_n [1, B, HIDDEN]))
    """
    wih_t, whh_t, bias, wout_t, bout = params
    B, T, I = x.shape
    assert I == INPUT_SIZE
    H = HIDDEN

    if h_state is None:
        h0 = jnp.zeros((B, H), jnp.float32)
        c0 = jnp.zeros((B, H), jnp.float32)
    else:
        h0 = h_state[0][0].astype(jnp.float32)
        c0 = h_state[1][0].astype(jnp.float32)

    # T blocking: the grid axis is strictly sequential, so every grid step pays
    # un-hidable per-step pipeline overhead -> use large blocks (cap 512).
    T_BLOCK = max(1, min(T, t_block_cap))
    num_blocks = pl.cdiv(T, T_BLOCK)
    T_pad = num_blocks * T_BLOCK

    # Raw x (time-major, flattened t*B+b) lives entirely in SMEM.
    # TODO(synk): for very long sequences (T*B*4 bytes beyond SMEM capacity),
    # stream x in per-block chunks instead of one resident SMEM array.
    x_flat = jnp.transpose(x, (1, 0, 2)).astype(jnp.float32).reshape(T * B)
    if T_pad != T:
        x_flat = jnp.pad(x_flat, (0, (T_pad - T) * B))

    wout_row = wout_t.reshape(1, H)          # out.weight as a [1, H] row

    kernel = _make_lstm_kernel(T, T_BLOCK, B, needs_mask=(T_pad != T))

    grid_spec = pltpu.PrefetchScalarGridSpec(
        num_scalar_prefetch=0,
        grid=(num_blocks,),
        in_specs=[
            pl.BlockSpec(memory_space=pltpu.MemorySpace.SMEM),   # x_flat (SMEM)
            pl.BlockSpec((1, 4 * H), lambda g: (0, 0)),          # W_ih row
            pl.BlockSpec((1, 4 * H), lambda g: (0, 0)),          # merged bias
            pl.BlockSpec((H, 4 * H), lambda g: (0, 0)),          # W_hh^T
            pl.BlockSpec((1, H), lambda g: (0, 0)),              # out.weight row
            pl.BlockSpec((1, 1), lambda g: (0, 0)),              # out.bias
            pl.BlockSpec((B, H), lambda g: (0, 0)),              # h0
            pl.BlockSpec((B, H), lambda g: (0, 0)),              # c0
        ],
        out_specs=[
            pl.BlockSpec((T_BLOCK, B, 1), lambda g: (g, 0, 0)),  # y block
            pl.BlockSpec((B, H), lambda g: (0, 0)),              # h_n
            pl.BlockSpec((B, H), lambda g: (0, 0)),              # c_n
        ],
        scratch_shapes=[
            pltpu.VMEM((B, H), jnp.float32),                     # h carry
            pltpu.VMEM((B, H), jnp.float32),                     # c carry
            pltpu.VMEM((T_BLOCK, B, H), jnp.float32),            # block h traj.
        ],
    )

    y_pad, h_n, c_n = pl.pallas_call(
        kernel,
        out_shape=(
            jax.ShapeDtypeStruct((T_pad, B, 1), jnp.float32),
            jax.ShapeDtypeStruct((B, H), jnp.float32),
            jax.ShapeDtypeStruct((B, H), jnp.float32),
        ),
        grid_spec=grid_spec,
        compiler_params=pltpu.CompilerParams(
            dimension_semantics=("arbitrary",),   # time recurrence: sequential
        ),
    )(x_flat, wih_t, bias, whh_t, wout_row, bout, h0, c0)

    outs = jnp.transpose(y_pad[:T], (1, 0, 2))                   # [B, T, 1]
    return outs, (h_n[None, ...], c_n[None, ...])


def init_params(key):
    """Deterministic parameter init mirroring the PyTorch module's shapes.

    weight_ih_l0: [4H, I], weight_hh_l0: [4H, H], bias_ih_l0/bias_hh_l0: [4H]
    out.weight:   [1, H],  out.bias: [1]
    (uniform(-1/sqrt(H), 1/sqrt(H)) like PyTorch's default init)
    """
    k = 1.0 / jnp.sqrt(jnp.float32(HIDDEN))
    ks = jax.random.split(key, 6)
    w_ih = jax.random.uniform(ks[0], (4 * HIDDEN, INPUT_SIZE), jnp.float32, -k, k)
    w_hh = jax.random.uniform(ks[1], (4 * HIDDEN, HIDDEN), jnp.float32, -k, k)
    b_ih = jax.random.uniform(ks[2], (4 * HIDDEN,), jnp.float32, -k, k)
    b_hh = jax.random.uniform(ks[3], (4 * HIDDEN,), jnp.float32, -k, k)
    w_out = jax.random.uniform(ks[4], (1, HIDDEN), jnp.float32, -k, k)
    b_out = jax.random.uniform(ks[5], (1,), jnp.float32, -k, k)

    # transposed / merged forms consumed by the kernel / wrapper
    wih_t = w_ih.T                                  # [I, 4H]
    whh_t = w_hh.T                                  # [H, 4H]
    bias = (b_ih + b_hh).reshape(1, 4 * HIDDEN)     # [1, 4H]
    wout_t = w_out.T                                # [H, 1]
    bout = b_out.reshape(1, 1)                      # [1, 1]
    return (wih_t, whh_t, bias, wout_t, bout)


def rnn_forward_ref(x, params, h_state=None):
    """Pure-JAX reference (same math) for a correctness check."""
    wih_t, whh_t, bias, wout_t, bout = params
    B, T, _ = x.shape
    if h_state is None:
        h = jnp.zeros((B, HIDDEN), jnp.float32)
        c = jnp.zeros((B, HIDDEN), jnp.float32)
    else:
        h, c = h_state[0][0], h_state[1][0]

    def step(carry, x_t):
        h, c = carry
        gates = x_t @ wih_t + h @ whh_t + bias
        i = jax.nn.sigmoid(gates[:, 0 * HIDDEN:1 * HIDDEN])
        f = jax.nn.sigmoid(gates[:, 1 * HIDDEN:2 * HIDDEN])
        g = jnp.tanh(gates[:, 2 * HIDDEN:3 * HIDDEN])
        o = jax.nn.sigmoid(gates[:, 3 * HIDDEN:4 * HIDDEN])
        c = f * c + i * g
        h = o * jnp.tanh(c)
        y = h @ wout_t + bout
        return (h, c), y

    (h, c), ys = jax.lax.scan(step, (h, c), jnp.transpose(x, (1, 0, 2)))
    return jnp.transpose(ys, (1, 0, 2)), (h[None], c[None])


if __name__ == "__main__":
    key = jax.random.PRNGKey(0)
    pkey, xkey, hkey, ckey = jax.random.split(key, 4)

    params = init_params(pkey)

    # --- case 1: module's usage (h_state=None), B=2, T=8, single block ---
    B, T = 2, 8
    x = jax.random.normal(xkey, (B, T, INPUT_SIZE), jnp.float32)
    outs, (h_n, c_n) = rnn_forward(x, params, None)
    jax.block_until_ready(outs)
    jax.block_until_ready(h_n)
    jax.block_until_ready(c_n)

    outs_ref, (h_ref, c_ref) = rnn_forward_ref(x, params, None)
    assert outs.shape == (B, T, 1)
    assert h_n.shape == (1, B, HIDDEN) and c_n.shape == (1, B, HIDDEN)
    assert jnp.allclose(outs, outs_ref, rtol=1e-4, atol=1e-4)
    assert jnp.allclose(h_n, h_ref, rtol=1e-4, atol=1e-4)
    assert jnp.allclose(c_n, c_ref, rtol=1e-4, atol=1e-4)

    # --- case 2: multi-block grid + tail masking + provided h_state ---
    B2, T2 = 2, 11
    x2 = jax.random.normal(jax.random.fold_in(xkey, 1),
                           (B2, T2, INPUT_SIZE), jnp.float32)
    h0 = 0.1 * jax.random.normal(hkey, (1, B2, HIDDEN), jnp.float32)
    c0 = 0.1 * jax.random.normal(ckey, (1, B2, HIDDEN), jnp.float32)
    outs2, (h_n2, c_n2) = rnn_forward(x2, params, (h0, c0), t_block_cap=4)
    jax.block_until_ready(outs2)

    outs2_ref, (h2_ref, c2_ref) = rnn_forward_ref(x2, params, (h0, c0))
    assert jnp.allclose(outs2, outs2_ref, rtol=1e-4, atol=1e-4)
    assert jnp.allclose(h_n2, h2_ref, rtol=1e-4, atol=1e-4)
    assert jnp.allclose(c_n2, c2_ref, rtol=1e-4, atol=1e-4)

    print("KERNEL_OK")
</pallas_src>

<mosaic_0001>
module attributes {stable_mosaic.version = 11 : i64} {
  func.func @kernel(%arg0: i32, %arg1: memref<16xf32, #tpu.memory_space<smem>>, %arg2: memref<1x128xf32, #tpu.memory_space<vmem>>, %arg3: memref<1x128xf32, #tpu.memory_space<vmem>>, %arg4: memref<32x128xf32, #tpu.memory_space<vmem>>, %arg5: memref<1x32xf32, #tpu.memory_space<vmem>>, %arg6: memref<1x1xf32, #tpu.memory_space<vmem>>, %arg7: memref<2x32xf32, #tpu.memory_space<vmem>>, %arg8: memref<2x32xf32, #tpu.memory_space<vmem>>, %arg9: memref<8x2x1xf32, #tpu.memory_space<vmem>>, %arg10: memref<2x32xf32, #tpu.memory_space<vmem>>, %arg11: memref<2x32xf32, #tpu.memory_space<vmem>>, %arg12: memref<2x32xf32, #tpu.memory_space<vmem>>, %arg13: memref<2x32xf32, #tpu.memory_space<vmem>>, %arg14: memref<8x2x32xf32, #tpu.memory_space<vmem>>) attributes {dimension_semantics = [#tpu.dimension_semantics<arbitrary>], iteration_bounds = array<i64: 1>, scalar_prefetch = 0 : i64, scratch_operands = 3 : i64, tpu.core_type = #tpu.core_type<tc>, window_params = [{transform_indices = @transform_0, window_bounds = array<i64: 16>}, {pipeline_mode = #tpu.pipeline_mode<synchronous>, transform_indices = @transform_1, window_bounds = array<i64: 1, 128>}, {pipeline_mode = #tpu.pipeline_mode<synchronous>, transform_indices = @transform_2, window_bounds = array<i64: 1, 128>}, {pipeline_mode = #tpu.pipeline_mode<synchronous>, transform_indices = @transform_3, window_bounds = array<i64: 32, 128>}, {pipeline_mode = #tpu.pipeline_mode<synchronous>, transform_indices = @transform_4, window_bounds = array<i64: 1, 32>}, {pipeline_mode = #tpu.pipeline_mode<synchronous>, transform_indices = @transform_5, window_bounds = array<i64: 1, 1>}, {pipeline_mode = #tpu.pipeline_mode<synchronous>, transform_indices = @transform_6, window_bounds = array<i64: 2, 32>}, {pipeline_mode = #tpu.pipeline_mode<synchronous>, transform_indices = @transform_7, window_bounds = array<i64: 2, 32>}, {transform_indices = @transform_8, window_bounds = array<i64: 8, 2, 1>}, {pipeline_mode = #tpu.pipeline_mode<synchronous>, transform_indices = @transform_9, window_bounds = array<i64: 2, 32>}, {pipeline_mode = #tpu.pipeline_mode<synchronous>, transform_indices = @transform_10, window_bounds = array<i64: 2, 32>}]} {
    %c0_i32 = arith.constant 0 : i32
    %0 = arith.cmpi eq, %arg0, %c0_i32 : i32
    %1 = arith.extui %0 : i1 to i32
    %c0_i32_0 = arith.constant 0 : i32
    %2 = arith.cmpi ne, %1, %c0_i32_0 : i32
    scf.if %2 {
      %c0_91 = arith.constant 0 : index
      %c0_92 = arith.constant 0 : index
      %330 = vector.load %arg7[%c0_91, %c0_92] : memref<2x32xf32, #tpu.memory_space<vmem>>, vector<2x32xf32>
      %c0_93 = arith.constant 0 : index
      %c0_94 = arith.constant 0 : index
      %331 = vector.load %arg12[%c0_93, %c0_94] : memref<2x32xf32, #tpu.memory_space<vmem>>, vector<2x32xf32>
      tpu.vector_store %arg12[%c0_93, %c0_94], %330 {strides = array<i32>} : memref<2x32xf32, #tpu.memory_space<vmem>>, vector<2x32xf32>,
      %c0_95 = arith.constant 0 : index
      %c0_96 = arith.constant 0 : index
      %332 = vector.load %arg8[%c0_95, %c0_96] : memref<2x32xf32, #tpu.memory_space<vmem>>, vector<2x32xf32>
      %c0_97 = arith.constant 0 : index
      %c0_98 = arith.constant 0 : index
      %333 = vector.load %arg13[%c0_97, %c0_98] : memref<2x32xf32, #tpu.memory_space<vmem>>, vector<2x32xf32>
      tpu.vector_store %arg13[%c0_97, %c0_98], %332 {strides = array<i32>} : memref<2x32xf32, #tpu.memory_space<vmem>>, vector<2x32xf32>,
    } else {
    }
    %c0 = arith.constant 0 : index
    %c0_1 = arith.constant 0 : index
    %3 = vector.load %arg4[%c0, %c0_1] : memref<32x128xf32, #tpu.memory_space<vmem>>, vector<32x128xf32>
    %c0_2 = arith.constant 0 : index
    %c0_3 = arith.constant 0 : index
    %4 = vector.load %arg2[%c0_2, %c0_3] : memref<1x128xf32, #tpu.memory_space<vmem>>, vector<1x128xf32>
    %c0_4 = arith.constant 0 : index
    %c0_5 = arith.constant 0 : index
    %5 = vector.load %arg3[%c0_4, %c0_5] : memref<1x128xf32, #tpu.memory_space<vmem>>, vector<1x128xf32>
    %c16_i32 = arith.constant 16 : i32
    %6 = arith.muli %arg0, %c16_i32 : i32
    %c0_6 = arith.constant 0 : index
    %c0_7 = arith.constant 0 : index
    %7 = vector.load %arg12[%c0_6, %c0_7] : memref<2x32xf32, #tpu.memory_space<vmem>>, vector<2x32xf32>
    %c0_8 = arith.constant 0 : index
    %c0_9 = arith.constant 0 : index
    %8 = vector.load %arg13[%c0_8, %c0_9] : memref<2x32xf32, #tpu.memory_space<vmem>>, vector<2x32xf32>
    %c0_i32_10 = arith.constant 0 : i32
    %c2_i32 = arith.constant 2 : i32
    %9 = arith.muli %c0_i32_10, %c2_i32 : i32
    %10 = arith.addi %6, %9 : i32
    %c0_i32_11 = arith.constant 0 : i32
    %11 = arith.addi %10, %c0_i32_11 : i32
    %12 = arith.index_cast %11 : i32 to index
    %13 = memref.load %arg1[%12] : memref<16xf32, #tpu.memory_space<smem>>
    %14 = vector.broadcast %13 : f32 to vector<1x128xf32>
    %15 = arith.mulf %14, %4 : vector<1x128xf32>
    %c2_i32_12 = arith.constant 2 : i32
    %16 = arith.muli %c0_i32_10, %c2_i32_12 : i32
    %17 = arith.addi %6, %16 : i32
    %c1_i32 = arith.constant 1 : i32
    %18 = arith.addi %17, %c1_i32 : i32
    %19 = arith.index_cast %18 : i32 to index
    %20 = memref.load %arg1[%19] : memref<16xf32, #tpu.memory_space<smem>>
    %21 = vector.broadcast %20 : f32 to vector<1x128xf32>
    %22 = arith.mulf %21, %4 : vector<1x128xf32>
    %23 = tpu.concatenate %15, %22 in 0 : vector<1x128xf32>, vector<1x128xf32> -> vector<2x128xf32>
    %24 = vector.broadcast %5 : vector<1x128xf32> to vector<2x128xf32>
    %25 = arith.addf %23, %24 : vector<2x128xf32>
    %cst = arith.constant dense<0.000000e+00> : vector<2x128xf32>
    %26 = tpu.matmul %7, %3, %cst {dimension_numbers = #tpu.dot_dimension_numbers<[1], [0], [0], [1], [0, 0, 1, 1], [], []>} : vector<2x32xf32>, vector<32x128xf32>, vector<2x128xf32> -> vector<2x128xf32>
    %27 = arith.addf %25, %26 : vector<2x128xf32>
    %28 = arith.negf %27 : vector<2x128xf32>
    %29 = math.exp %28 : vector<2x128xf32>
    %cst_13 = arith.constant 1.000000e+00 : f32
    %30 = vector.broadcast %cst_13 : f32 to vector<2x128xf32>
    %31 = arith.addf %30, %29 : vector<2x128xf32>
    %32 = arith.divf %30, %31 : vector<2x128xf32>
    %33 = math.tanh %27 : vector<2x128xf32>
    %34 = vector.extract_strided_slice %32 {offsets = [0, 0], sizes = [2, 32], strides = [1, 1]} : vector<2x128xf32> to vector<2x32xf32>
    %35 = vector.extract_strided_slice %32 {offsets = [0, 32], sizes = [2, 32], strides = [1, 1]} : vector<2x128xf32> to vector<2x32xf32>
    %36 = vector.extract_strided_slice %32 {offsets = [0, 96], sizes = [2, 32], strides = [1, 1]} : vector<2x128xf32> to vector<2x32xf32>
    %37 = vector.extract_strided_slice %33 {offsets = [0, 64], sizes = [2, 32], strides = [1, 1]} : vector<2x128xf32> to vector<2x32xf32>
    %38 = arith.mulf %35, %8 : vector<2x32xf32>
    %39 = arith.mulf %34, %37 : vector<2x32xf32>
    %40 = arith.addf %38, %39 : vector<2x32xf32>
    %41 = math.tanh %40 : vector<2x32xf32>
    %42 = arith.mulf %36, %41 : vector<2x32xf32>
    %43 = arith.index_cast %c0_i32_10 : i32 to index
    %c0_14 = arith.constant 0 : index
    %c0_15 = arith.constant 0 : index
    %44 = vector.load %arg14[%43, %c0_14, %c0_15] : memref<8x2x32xf32, #tpu.memory_space<vmem>>, vector<1x2x32xf32>
    %45 = vector.shape_cast %44 : vector<1x2x32xf32> to vector<2x32xf32>
    %46 = vector.shape_cast %42 : vector<2x32xf32> to vector<1x2x32xf32>
    tpu.vector_store %arg14[%43, %c0_14, %c0_15], %46 {strides = array<i32>} : memref<8x2x32xf32, #tpu.memory_space<vmem>>, vector<1x2x32xf32>,
    %c1_i32_16 = arith.constant 1 : i32
    %c2_i32_17 = arith.constant 2 : i32
    %47 = arith.muli %c1_i32_16, %c2_i32_17 : i32
    %48 = arith.addi %6, %47 : i32
    %c0_i32_18 = arith.constant 0 : i32
    %49 = arith.addi %48, %c0_i32_18 : i32
    %50 = arith.index_cast %49 : i32 to index
    %51 = memref.load %arg1[%50] : memref<16xf32, #tpu.memory_space<smem>>
    %52 = vector.broadcast %51 : f32 to vector<1x128xf32>
    %53 = arith.mulf %52, %4 : vector<1x128xf32>
    %c2_i32_19 = arith.constant 2 : i32
    %54 = arith.muli %c1_i32_16, %c2_i32_19 : i32
    %55 = arith.addi %6, %54 : i32
    %c1_i32_20 = arith.constant 1 : i32
    %56 = arith.addi %55, %c1_i32_20 : i32
    %57 = arith.index_cast %56 : i32 to index
    %58 = memref.load %arg1[%57] : memref<16xf32, #tpu.memory_space<smem>>
    %59 = vector.broadcast %58 : f32 to vector<1x128xf32>
    %60 = arith.mulf %59, %4 : vector<1x128xf32>
    %61 = tpu.concatenate %53, %60 in 0 : vector<1x128xf32>, vector<1x128xf32> -> vector<2x128xf32>
    %62 = vector.broadcast %5 : vector<1x128xf32> to vector<2x128xf32>
    %63 = arith.addf %61, %62 : vector<2x128xf32>
    %cst_21 = arith.constant dense<0.000000e+00> : vector<2x128xf32>
    %64 = tpu.matmul %42, %3, %cst_21 {dimension_numbers = #tpu.dot_dimension_numbers<[1], [0], [0], [1], [0, 0, 1, 1], [], []>} : vector<2x32xf32>, vector<32x128xf32>, vector<2x128xf32> -> vector<2x128xf32>
    %65 = arith.addf %63, %64 : vector<2x128xf32>
    %66 = arith.negf %65 : vector<2x128xf32>
    %67 = math.exp %66 : vector<2x128xf32>
    %cst_22 = arith.constant 1.000000e+00 : f32
    %68 = vector.broadcast %cst_22 : f32 to vector<2x128xf32>
    %69 = arith.addf %68, %67 : vector<2x128xf32>
    %70 = arith.divf %68, %69 : vector<2x128xf32>
    %71 = math.tanh %65 : vector<2x128xf32>
    %72 = vector.extract_strided_slice %70 {offsets = [0, 0], sizes = [2, 32], strides = [1, 1]} : vector<2x128xf32> to vector<2x32xf32>
    %73 = vector.extract_strided_slice %70 {offsets = [0, 32], sizes = [2, 32], strides = [1, 1]} : vector<2x128xf32> to vector<2x32xf32>
    %74 = vector.extract_strided_slice %70 {offsets = [0, 96], sizes = [2, 32], strides = [1, 1]} : vector<2x128xf32> to vector<2x32xf32>
    %75 = vector.extract_strided_slice %71 {offsets = [0, 64], sizes = [2, 32], strides = [1, 1]} : vector<2x128xf32> to vector<2x32xf32>
    %76 = arith.mulf %73, %40 : vector<2x32xf32>
    %77 = arith.mulf %72, %75 : vector<2x32xf32>
    %78 = arith.addf %76, %77 : vector<2x32xf32>
    %79 = math.tanh %78 : vector<2x32xf32>
    %80 = arith.mulf %74, %79 : vector<2x32xf32>
    %81 = arith.index_cast %c1_i32_16 : i32 to index
    %c0_23 = arith.constant 0 : index
    %c0_24 = arith.constant 0 : index
    %82 = vector.load %arg14[%81, %c0_23, %c0_24] : memref<8x2x32xf32, #tpu.memory_space<vmem>>, vector<1x2x32xf32>
    %83 = vector.shape_cast %82 : vector<1x2x32xf32> to vector<2x32xf32>
    %84 = vector.shape_cast %80 : vector<2x32xf32> to vector<1x2x32xf32>
    tpu.vector_store %arg14[%81, %c0_23, %c0_24], %84 {strides = array<i32>} : memref<8x2x32xf32, #tpu.memory_space<vmem>>, vector<1x2x32xf32>,
    %c2_i32_25 = arith.constant 2 : i32
    %c2_i32_26 = arith.constant 2 : i32
    %85 = arith.muli %c2_i32_25, %c2_i32_26 : i32
    %86 = arith.addi %6, %85 : i32
    %c0_i32_27 = arith.constant 0 : i32
    %87 = arith.addi %86, %c0_i32_27 : i32
    %88 = arith.index_cast %87 : i32 to index
    %89 = memref.load %arg1[%88] : memref<16xf32, #tpu.memory_space<smem>>
    %90 = vector.broadcast %89 : f32 to vector<1x128xf32>
    %91 = arith.mulf %90, %4 : vector<1x128xf32>
    %c2_i32_28 = arith.constant 2 : i32
    %92 = arith.muli %c2_i32_25, %c2_i32_28 : i32
    %93 = arith.addi %6, %92 : i32
    %c1_i32_29 = arith.constant 1 : i32
    %94 = arith.addi %93, %c1_i32_29 : i32
    %95 = arith.index_cast %94 : i32 to index
    %96 = memref.load %arg1[%95] : memref<16xf32, #tpu.memory_space<smem>>
    %97 = vector.broadcast %96 : f32 to vector<1x128xf32>
    %98 = arith.mulf %97, %4 : vector<1x128xf32>
    %99 = tpu.concatenate %91, %98 in 0 : vector<1x128xf32>, vector<1x128xf32> -> vector<2x128xf32>
    %100 = vector.broadcast %5 : vector<1x128xf32> to vector<2x128xf32>
    %101 = arith.addf %99, %100 : vector<2x128xf32>
    %cst_30 = arith.constant dense<0.000000e+00> : vector<2x128xf32>
    %102 = tpu.matmul %80, %3, %cst_30 {dimension_numbers = #tpu.dot_dimension_numbers<[1], [0], [0], [1], [0, 0, 1, 1], [], []>} : vector<2x32xf32>, vector<32x128xf32>, vector<2x128xf32> -> vector<2x128xf32>
    %103 = arith.addf %101, %102 : vector<2x128xf32>
    %104 = arith.negf %103 : vector<2x128xf32>
    %105 = math.exp %104 : vector<2x128xf32>
    %cst_31 = arith.constant 1.000000e+00 : f32
    %106 = vector.broadcast %cst_31 : f32 to vector<2x128xf32>
    %107 = arith.addf %106, %105 : vector<2x128xf32>
    %108 = arith.divf %106, %107 : vector<2x128xf32>
    %109 = math.tanh %103 : vector<2x128xf32>
    %110 = vector.extract_strided_slice %108 {offsets = [0, 0], sizes = [2, 32], strides = [1, 1]} : vector<2x128xf32> to vector<2x32xf32>
    %111 = vector.extract_strided_slice %108 {offsets = [0, 32], sizes = [2, 32], strides = [1, 1]} : vector<2x128xf32> to vector<2x32xf32>
    %112 = vector.extract_strided_slice %108 {offsets = [0, 96], sizes = [2, 32], strides = [1, 1]} : vector<2x128xf32> to vector<2x32xf32>
    %113 = vector.extract_strided_slice %109 {offsets = [0, 64], sizes = [2, 32], strides = [1, 1]} : vector<2x128xf32> to vector<2x32xf32>
    %114 = arith.mulf %111, %78 : vector<2x32xf32>
    %115 = arith.mulf %110, %113 : vector<2x32xf32>
    %116 = arith.addf %114, %115 : vector<2x32xf32>
    %117 = math.tanh %116 : vector<2x32xf32>
    %118 = arith.mulf %112, %117 : vector<2x32xf32>
    %119 = arith.index_cast %c2_i32_25 : i32 to index
    %c0_32 = arith.constant 0 : index
    %c0_33 = arith.constant 0 : index
    %120 = vector.load %arg14[%119, %c0_32, %c0_33] : memref<8x2x32xf32, #tpu.memory_space<vmem>>, vector<1x2x32xf32>
    %121 = vector.shape_cast %120 : vector<1x2x32xf32> to vector<2x32xf32>
    %122 = vector.shape_cast %118 : vector<2x32xf32> to vector<1x2x32xf32>
    tpu.vector_store %arg14[%119, %c0_32, %c0_33], %122 {strides = array<i32>} : memref<8x2x32xf32, #tpu.memory_space<vmem>>, vector<1x2x32xf32>,
    %c3_i32 = arith.constant 3 : i32
    %c2_i32_34 = arith.constant 2 : i32
    %123 = arith.muli %c3_i32, %c2_i32_34 : i32
    %124 = arith.addi %6, %123 : i32
    %c0_i32_35 = arith.constant 0 : i32
    %125 = arith.addi %124, %c0_i32_35 : i32
    %126 = arith.index_cast %125 : i32 to index
    %127 = memref.load %arg1[%126] : memref<16xf32, #tpu.memory_space<smem>>
    %128 = vector.broadcast %127 : f32 to vector<1x128xf32>
    %129 = arith.mulf %128, %4 : vector<1x128xf32>
    %c2_i32_36 = arith.constant 2 : i32
    %130 = arith.muli %c3_i32, %c2_i32_36 : i32
    %131 = arith.addi %6, %130 : i32
    %c1_i32_37 = arith.constant 1 : i32
    %132 = arith.addi %131, %c1_i32_37 : i32
    %133 = arith.index_cast %132 : i32 to index
    %134 = memref.load %arg1[%133] : memref<16xf32, #tpu.memory_space<smem>>
    %135 = vector.broadcast %134 : f32 to vector<1x128xf32>
    %136 = arith.mulf %135, %4 : vector<1x128xf32>
    %137 = tpu.concatenate %129, %136 in 0 : vector<1x128xf32>, vector<1x128xf32> -> vector<2x128xf32>
    %138 = vector.broadcast %5 : vector<1x128xf32> to vector<2x128xf32>
    %139 = arith.addf %137, %138 : vector<2x128xf32>
    %cst_38 = arith.constant dense<0.000000e+00> : vector<2x128xf32>
    %140 = tpu.matmul %118, %3, %cst_38 {dimension_numbers = #tpu.dot_dimension_numbers<[1], [0], [0], [1], [0, 0, 1, 1], [], []>} : vector<2x32xf32>, vector<32x128xf32>, vector<2x128xf32> -> vector<2x128xf32>
    %141 = arith.addf %139, %140 : vector<2x128xf32>
    %142 = arith.negf %141 : vector<2x128xf32>
    %143 = math.exp %142 : vector<2x128xf32>
    %cst_39 = arith.constant 1.000000e+00 : f32
    %144 = vector.broadcast %cst_39 : f32 to vector<2x128xf32>
    %145 = arith.addf %144, %143 : vector<2x128xf32>
    %146 = arith.divf %144, %145 : vector<2x128xf32>
    %147 = math.tanh %141 : vector<2x128xf32>
    %148 = vector.extract_strided_slice %146 {offsets = [0, 0], sizes = [2, 32], strides = [1, 1]} : vector<2x128xf32> to vector<2x32xf32>
    %149 = vector.extract_strided_slice %146 {offsets = [0, 32], sizes = [2, 32], strides = [1, 1]} : vector<2x128xf32> to vector<2x32xf32>
    %150 = vector.extract_strided_slice %146 {offsets = [0, 96], sizes = [2, 32], strides = [1, 1]} : vector<2x128xf32> to vector<2x32xf32>
    %151 = vector.extract_strided_slice %147 {offsets = [0, 64], sizes = [2, 32], strides = [1, 1]} : vector<2x128xf32> to vector<2x32xf32>
    %152 = arith.mulf %149, %116 : vector<2x32xf32>
    %153 = arith.mulf %148, %151 : vector<2x32xf32>
    %154 = arith.addf %152, %153 : vector<2x32xf32>
    %155 = math.tanh %154 : vector<2x32xf32>
    %156 = arith.mulf %150, %155 : vector<2x32xf32>
    %157 = arith.index_cast %c3_i32 : i32 to index
    %c0_40 = arith.constant 0 : index
    %c0_41 = arith.constant 0 : index
    %158 = vector.load %arg14[%157, %c0_40, %c0_41] : memref<8x2x32xf32, #tpu.memory_space<vmem>>, vector<1x2x32xf32>
    %159 = vector.shape_cast %158 : vector<1x2x32xf32> to vector<2x32xf32>
    %160 = vector.shape_cast %156 : vector<2x32xf32> to vector<1x2x32xf32>
    tpu.vector_store %arg14[%157, %c0_40, %c0_41], %160 {strides = array<i32>} : memref<8x2x32xf32, #tpu.memory_space<vmem>>, vector<1x2x32xf32>,
    %c4_i32 = arith.constant 4 : i32
    %c2_i32_42 = arith.constant 2 : i32
    %161 = arith.muli %c4_i32, %c2_i32_42 : i32
    %162 = arith.addi %6, %161 : i32
    %c0_i32_43 = arith.constant 0 : i32
    %163 = arith.addi %162, %c0_i32_43 : i32
    %164 = arith.index_cast %163 : i32 to index
    %165 = memref.load %arg1[%164] : memref<16xf32, #tpu.memory_space<smem>>
    %166 = vector.broadcast %165 : f32 to vector<1x128xf32>
    %167 = arith.mulf %166, %4 : vector<1x128xf32>
    %c2_i32_44 = arith.constant 2 : i32
    %168 = arith.muli %c4_i32, %c2_i32_44 : i32
    %169 = arith.addi %6, %168 : i32
    %c1_i32_45 = arith.constant 1 : i32
    %170 = arith.addi %169, %c1_i32_45 : i32
    %171 = arith.index_cast %170 : i32 to index
    %172 = memref.load %arg1[%171] : memref<16xf32, #tpu.memory_space<smem>>
    %173 = vector.broadcast %172 : f32 to vector<1x128xf32>
    %174 = arith.mulf %173, %4 : vector<1x128xf32>
    %175 = tpu.concatenate %167, %174 in 0 : vector<1x128xf32>, vector<1x128xf32> -> vector<2x128xf32>
    %176 = vector.broadcast %5 : vector<1x128xf32> to vector<2x128xf32>
    %177 = arith.addf %175, %176 : vector<2x128xf32>
    %cst_46 = arith.constant dense<0.000000e+00> : vector<2x128xf32>
    %178 = tpu.matmul %156, %3, %cst_46 {dimension_numbers = #tpu.dot_dimension_numbers<[1], [0], [0], [1], [0, 0, 1, 1], [], []>} : vector<2x32xf32>, vector<32x128xf32>, vector<2x128xf32> -> vector<2x128xf32>
    %179 = arith.addf %177, %178 : vector<2x128xf32>
    %180 = arith.negf %179 : vector<2x128xf32>
    %181 = math.exp %180 : vector<2x128xf32>
    %cst_47 = arith.constant 1.000000e+00 : f32
    %182 = vector.broadcast %cst_47 : f32 to vector<2x128xf32>
    %183 = arith.addf %182, %181 : vector<2x128xf32>
    %184 = arith.divf %182, %183 : vector<2x128xf32>
    %185 = math.tanh %179 : vector<2x128xf32>
    %186 = vector.extract_strided_slice %184 {offsets = [0, 0], sizes = [2, 32], strides = [1, 1]} : vector<2x128xf32> to vector<2x32xf32>
    %187 = vector.extract_strided_slice %184 {offsets = [0, 32], sizes = [2, 32], strides = [1, 1]} : vector<2x128xf32> to vector<2x32xf32>
    %188 = vector.extract_strided_slice %184 {offsets = [0, 96], sizes = [2, 32], strides = [1, 1]} : vector<2x128xf32> to vector<2x32xf32>
    %189 = vector.extract_strided_slice %185 {offsets = [0, 64], sizes = [2, 32], strides = [1, 1]} : vector<2x128xf32> to vector<2x32xf32>
    %190 = arith.mulf %187, %154 : vector<2x32xf32>
    %191 = arith.mulf %186, %189 : vector<2x32xf32>
    %192 = arith.addf %190, %191 : vector<2x32xf32>
    %193 = math.tanh %192 : vector<2x32xf32>
    %194 = arith.mulf %188, %193 : vector<2x32xf32>
    %195 = arith.index_cast %c4_i32 : i32 to index
    %c0_48 = arith.constant 0 : index
    %c0_49 = arith.constant 0 : index
    %196 = vector.load %arg14[%195, %c0_48, %c0_49] : memref<8x2x32xf32, #tpu.memory_space<vmem>>, vector<1x2x32xf32>
    %197 = vector.shape_cast %196 : vector<1x2x32xf32> to vector<2x32xf32>
    %198 = vector.shape_cast %194 : vector<2x32xf32> to vector<1x2x32xf32>
    tpu.vector_store %arg14[%195, %c0_48, %c0_49], %198 {strides = array<i32>} : memref<8x2x32xf32, #tpu.memory_space<vmem>>, vector<1x2x32xf32>,
    %c5_i32 = arith.constant 5 : i32
    %c2_i32_50 = arith.constant 2 : i32
    %199 = arith.muli %c5_i32, %c2_i32_50 : i32
    %200 = arith.addi %6, %199 : i32
    %c0_i32_51 = arith.constant 0 : i32
    %201 = arith.addi %200, %c0_i32_51 : i32
    %202 = arith.index_cast %201 : i32 to index
    %203 = memref.load %arg1[%202] : memref<16xf32, #tpu.memory_space<smem>>
    %204 = vector.broadcast %203 : f32 to vector<1x128xf32>
    %205 = arith.mulf %204, %4 : vector<1x128xf32>
    %c2_i32_52 = arith.constant 2 : i32
    %206 = arith.muli %c5_i32, %c2_i32_52 : i32
    %207 = arith.addi %6, %206 : i32
    %c1_i32_53 = arith.constant 1 : i32
    %208 = arith.addi %207, %c1_i32_53 : i32
    %209 = arith.index_cast %208 : i32 to index
    %210 = memref.load %arg1[%209] : memref<16xf32, #tpu.memory_space<smem>>
    %211 = vector.broadcast %210 : f32 to vector<1x128xf32>
    %212 = arith.mulf %211, %4 : vector<1x128xf32>
    %213 = tpu.concatenate %205, %212 in 0 : vector<1x128xf32>, vector<1x128xf32> -> vector<2x128xf32>
    %214 = vector.broadcast %5 : vector<1x128xf32> to vector<2x128xf32>
    %215 = arith.addf %213, %214 : vector<2x128xf32>
    %cst_54 = arith.constant dense<0.000000e+00> : vector<2x128xf32>
    %216 = tpu.matmul %194, %3, %cst_54 {dimension_numbers = #tpu.dot_dimension_numbers<[1], [0], [0], [1], [0, 0, 1, 1], [], []>} : vector<2x32xf32>, vector<32x128xf32>, vector<2x128xf32> -> vector<2x128xf32>
    %217 = arith.addf %215, %216 : vector<2x128xf32>
    %218 = arith.negf %217 : vector<2x128xf32>
    %219 = math.exp %218 : vector<2x128xf32>
    %cst_55 = arith.constant 1.000000e+00 : f32
    %220 = vector.broadcast %cst_55 : f32 to vector<2x128xf32>
    %221 = arith.addf %220, %219 : vector<2x128xf32>
    %222 = arith.divf %220, %221 : vector<2x128xf32>
    %223 = math.tanh %217 : vector<2x128xf32>
    %224 = vector.extract_strided_slice %222 {offsets = [0, 0], sizes = [2, 32], strides = [1, 1]} : vector<2x128xf32> to vector<2x32xf32>
    %225 = vector.extract_strided_slice %222 {offsets = [0, 32], sizes = [2, 32], strides = [1, 1]} : vector<2x128xf32> to vector<2x32xf32>
    %226 = vector.extract_strided_slice %222 {offsets = [0, 96], sizes = [2, 32], strides = [1, 1]} : vector<2x128xf32> to vector<2x32xf32>
    %227 = vector.extract_strided_slice %223 {offsets = [0, 64], sizes = [2, 32], strides = [1, 1]} : vector<2x128xf32> to vector<2x32xf32>
    %228 = arith.mulf %225, %192 : vector<2x32xf32>
    %229 = arith.mulf %224, %227 : vector<2x32xf32>
    %230 = arith.addf %228, %229 : vector<2x32xf32>
    %231 = math.tanh %230 : vector<2x32xf32>
    %232 = arith.mulf %226, %231 : vector<2x32xf32>
    %233 = arith.index_cast %c5_i32 : i32 to index
    %c0_56 = arith.constant 0 : index
    %c0_57 = arith.constant 0 : index
    %234 = vector.load %arg14[%233, %c0_56, %c0_57] : memref<8x2x32xf32, #tpu.memory_space<vmem>>, vector<1x2x32xf32>
    %235 = vector.shape_cast %234 : vector<1x2x32xf32> to vector<2x32xf32>
    %236 = vector.shape_cast %232 : vector<2x32xf32> to vector<1x2x32xf32>
    tpu.vector_store %arg14[%233, %c0_56, %c0_57], %236 {strides = array<i32>} : memref<8x2x32xf32, #tpu.memory_space<vmem>>, vector<1x2x32xf32>,
    %c6_i32 = arith.constant 6 : i32
    %c2_i32_58 = arith.constant 2 : i32
    %237 = arith.muli %c6_i32, %c2_i32_58 : i32
    %238 = arith.addi %6, %237 : i32
    %c0_i32_59 = arith.constant 0 : i32
    %239 = arith.addi %238, %c0_i32_59 : i32
    %240 = arith.index_cast %239 : i32 to index
    %241 = memref.load %arg1[%240] : memref<16xf32, #tpu.memory_space<smem>>
    %242 = vector.broadcast %241 : f32 to vector<1x128xf32>
    %243 = arith.mulf %242, %4 : vector<1x128xf32>
    %c2_i32_60 = arith.constant 2 : i32
    %244 = arith.muli %c6_i32, %c2_i32_60 : i32
    %245 = arith.addi %6, %244 : i32
    %c1_i32_61 = arith.constant 1 : i32
    %246 = arith.addi %245, %c1_i32_61 : i32
    %247 = arith.index_cast %246 : i32 to index
    %248 = memref.load %arg1[%247] : memref<16xf32, #tpu.memory_space<smem>>
    %249 = vector.broadcast %248 : f32 to vector<1x128xf32>
    %250 = arith.mulf %249, %4 : vector<1x128xf32>
    %251 = tpu.concatenate %243, %250 in 0 : vector<1x128xf32>, vector<1x128xf32> -> vector<2x128xf32>
    %252 = vector.broadcast %5 : vector<1x128xf32> to vector<2x128xf32>
    %253 = arith.addf %251, %252 : vector<2x128xf32>
    %cst_62 = arith.constant dense<0.000000e+00> : vector<2x128xf32>
    %254 = tpu.matmul %232, %3, %cst_62 {dimension_numbers = #tpu.dot_dimension_numbers<[1], [0], [0], [1], [0, 0, 1, 1], [], []>} : vector<2x32xf32>, vector<32x128xf32>, vector<2x128xf32> -> vector<2x128xf32>
    %255 = arith.addf %253, %254 : vector<2x128xf32>
    %256 = arith.negf %255 : vector<2x128xf32>
    %257 = math.exp %256 : vector<2x128xf32>
    %cst_63 = arith.constant 1.000000e+00 : f32
    %258 = vector.broadcast %cst_63 : f32 to vector<2x128xf32>
    %259 = arith.addf %258, %257 : vector<2x128xf32>
    %260 = arith.divf %258, %259 : vector<2x128xf32>
    %261 = math.tanh %255 : vector<2x128xf32>
    %262 = vector.extract_strided_slice %260 {offsets = [0, 0], sizes = [2, 32], strides = [1, 1]} : vector<2x128xf32> to vector<2x32xf32>
    %263 = vector.extract_strided_slice %260 {offsets = [0, 32], sizes = [2, 32], strides = [1, 1]} : vector<2x128xf32> to vector<2x32xf32>
    %264 = vector.extract_strided_slice %260 {offsets = [0, 96], sizes = [2, 32], strides = [1, 1]} : vector<2x128xf32> to vector<2x32xf32>
    %265 = vector.extract_strided_slice %261 {offsets = [0, 64], sizes = [2, 32], strides = [1, 1]} : vector<2x128xf32> to vector<2x32xf32>
    %266 = arith.mulf %263, %230 : vector<2x32xf32>
    %267 = arith.mulf %262, %265 : vector<2x32xf32>
    %268 = arith.addf %266, %267 : vector<2x32xf32>
    %269 = math.tanh %268 : vector<2x32xf32>
    %270 = arith.mulf %264, %269 : vector<2x32xf32>
    %271 = arith.index_cast %c6_i32 : i32 to index
    %c0_64 = arith.constant 0 : index
    %c0_65 = arith.constant 0 : index
    %272 = vector.load %arg14[%271, %c0_64, %c0_65] : memref<8x2x32xf32, #tpu.memory_space<vmem>>, vector<1x2x32xf32>
    %273 = vector.shape_cast %272 : vector<1x2x32xf32> to vector<2x32xf32>
    %274 = vector.shape_cast %270 : vector<2x32xf32> to vector<1x2x32xf32>
    tpu.vector_store %arg14[%271, %c0_64, %c0_65], %274 {strides = array<i32>} : memref<8x2x32xf32, #tpu.memory_space<vmem>>, vector<1x2x32xf32>,
    %c7_i32 = arith.constant 7 : i32
    %c2_i32_66 = arith.constant 2 : i32
    %275 = arith.muli %c7_i32, %c2_i32_66 : i32
    %276 = arith.addi %6, %275 : i32
    %c0_i32_67 = arith.constant 0 : i32
    %277 = arith.addi %276, %c0_i32_67 : i32
    %278 = arith.index_cast %277 : i32 to index
    %279 = memref.load %arg1[%278] : memref<16xf32, #tpu.memory_space<smem>>
    %280 = vector.broadcast %279 : f32 to vector<1x128xf32>
    %281 = arith.mulf %280, %4 : vector<1x128xf32>
    %c2_i32_68 = arith.constant 2 : i32
    %282 = arith.muli %c7_i32, %c2_i32_68 : i32
    %283 = arith.addi %6, %282 : i32
    %c1_i32_69 = arith.constant 1 : i32
    %284 = arith.addi %283, %c1_i32_69 : i32
    %285 = arith.index_cast %284 : i32 to index
    %286 = memref.load %arg1[%285] : memref<16xf32, #tpu.memory_space<smem>>
    %287 = vector.broadcast %286 : f32 to vector<1x128xf32>
    %288 = arith.mulf %287, %4 : vector<1x128xf32>
    %289 = tpu.concatenate %281, %288 in 0 : vector<1x128xf32>, vector<1x128xf32> -> vector<2x128xf32>
    %290 = vector.broadcast %5 : vector<1x128xf32> to vector<2x128xf32>
    %291 = arith.addf %289, %290 : vector<2x128xf32>
    %cst_70 = arith.constant dense<0.000000e+00> : vector<2x128xf32>
    %292 = tpu.matmul %270, %3, %cst_70 {dimension_numbers = #tpu.dot_dimension_numbers<[1], [0], [0], [1], [0, 0, 1, 1], [], []>} : vector<2x32xf32>, vector<32x128xf32>, vector<2x128xf32> -> vector<2x128xf32>
    %293 = arith.addf %291, %292 : vector<2x128xf32>
    %294 = arith.negf %293 : vector<2x128xf32>
    %295 = math.exp %294 : vector<2x128xf32>
    %cst_71 = arith.constant 1.000000e+00 : f32
    %296 = vector.broadcast %cst_71 : f32 to vector<2x128xf32>
    %297 = arith.addf %296, %295 : vector<2x128xf32>
    %298 = arith.divf %296, %297 : vector<2x128xf32>
    %299 = math.tanh %293 : vector<2x128xf32>
    %300 = vector.extract_strided_slice %298 {offsets = [0, 0], sizes = [2, 32], strides = [1, 1]} : vector<2x128xf32> to vector<2x32xf32>
    %301 = vector.extract_strided_slice %298 {offsets = [0, 32], sizes = [2, 32], strides = [1, 1]} : vector<2x128xf32> to vector<2x32xf32>
    %302 = vector.extract_strided_slice %298 {offsets = [0, 96], sizes = [2, 32], strides = [1, 1]} : vector<2x128xf32> to vector<2x32xf32>
    %303 = vector.extract_strided_slice %299 {offsets = [0, 64], sizes = [2, 32], strides = [1, 1]} : vector<2x128xf32> to vector<2x32xf32>
    %304 = arith.mulf %301, %268 : vector<2x32xf32>
    %305 = arith.mulf %300, %303 : vector<2x32xf32>
    %306 = arith.addf %304, %305 : vector<2x32xf32>
    %307 = math.tanh %306 : vector<2x32xf32>
    %308 = arith.mulf %302, %307 : vector<2x32xf32>
    %309 = arith.index_cast %c7_i32 : i32 to index
    %c0_72 = arith.constant 0 : index
    %c0_73 = arith.constant 0 : index
    %310 = vector.load %arg14[%309, %c0_72, %c0_73] : memref<8x2x32xf32, #tpu.memory_space<vmem>>, vector<1x2x32xf32>
    %311 = vector.shape_cast %310 : vector<1x2x32xf32> to vector<2x32xf32>
    %312 = vector.shape_cast %308 : vector<2x32xf32> to vector<1x2x32xf32>
    tpu.vector_store %arg14[%309, %c0_72, %c0_73], %312 {strides = array<i32>} : memref<8x2x32xf32, #tpu.memory_space<vmem>>, vector<1x2x32xf32>,
    %c8_i32 = arith.constant 8 : i32
    %c0_74 = arith.constant 0 : index
    %c0_75 = arith.constant 0 : index
    %313 = vector.load %arg12[%c0_74, %c0_75] : memref<2x32xf32, #tpu.memory_space<vmem>>, vector<2x32xf32>
    tpu.vector_store %arg12[%c0_74, %c0_75], %308 {strides = array<i32>} : memref<2x32xf32, #tpu.memory_space<vmem>>, vector<2x32xf32>,
    %c0_76 = arith.constant 0 : index
    %c0_77 = arith.constant 0 : index
    %314 = vector.load %arg13[%c0_76, %c0_77] : memref<2x32xf32, #tpu.memory_space<vmem>>, vector<2x32xf32>
    tpu.vector_store %arg13[%c0_76, %c0_77], %306 {strides = array<i32>} : memref<2x32xf32, #tpu.memory_space<vmem>>, vector<2x32xf32>,
    %c0_78 = arith.constant 0 : index
    %c0_79 = arith.constant 0 : index
    %c0_80 = arith.constant 0 : index
    %315 = vector.load %arg14[%c0_78, %c0_79, %c0_80] : memref<8x2x32xf32, #tpu.memory_space<vmem>>, vector<8x2x32xf32>
    %c0_81 = arith.constant 0 : index
    %c0_82 = arith.constant 0 : index
    %316 = vector.load %arg5[%c0_81, %c0_82] : memref<1x32xf32, #tpu.memory_space<vmem>>, vector<1x32xf32>
    %317 = vector.shape_cast %316 : vector<1x32xf32> to vector<1x1x32xf32>
    %318 = vector.broadcast %317 : vector<1x1x32xf32> to vector<8x2x32xf32>
    %319 = arith.mulf %315, %318 : vector<8x2x32xf32>
    %cst_83 = arith.constant dense<0.000000e+00> : vector<8x2xf32>
    %320 = vector.multi_reduction <add>, %319, %cst_83 [2] : vector<8x2x32xf32> to vector<8x2xf32>
    %321 = vector.shape_cast %320 : vector<8x2xf32> to vector<8x2x1xf32>
    %c0_84 = arith.constant 0 : index
    %c0_85 = arith.constant 0 : index
    %322 = vector.load %arg6[%c0_84, %c0_85] : memref<1x1xf32, #tpu.memory_space<vmem>>, vector<1x1xf32>
    %323 = vector.shape_cast %322 : vector<1x1xf32> to vector<1x1x1xf32>
    %324 = vector.broadcast %323 : vector<1x1x1xf32> to vector<8x2x1xf32>
    %325 = arith.addf %321, %324 : vector<8x2x1xf32>
    %c0_86 = arith.constant 0 : index
    %c0_87 = arith.constant 0 : index
    %c0_88 = arith.constant 0 : index
    %326 = vector.load %arg9[%c0_86, %c0_87, %c0_88] : memref<8x2x1xf32, #tpu.memory_space<vmem>>, vector<8x2x1xf32>
    tpu.vector_store %arg9[%c0_86, %c0_87, %c0_88], %325 {strides = array<i32>} : memref<8x2x1xf32, #tpu.memory_space<vmem>>, vector<8x2x1xf32>,
    %c0_i32_89 = arith.constant 0 : i32
    %327 = arith.cmpi eq, %arg0, %c0_i32_89 : i32
    %328 = arith.extui %327 : i1 to i32
    %c0_i32_90 = arith.constant 0 : i32
    %329 = arith.cmpi ne, %328, %c0_i32_90 : i32
    scf.if %329 {
      %c0_91 = arith.constant 0 : index
      %c0_92 = arith.constant 0 : index
      %330 = vector.load %arg10[%c0_91, %c0_92] : memref<2x32xf32, #tpu.memory_space<vmem>>, vector<2x32xf32>
      tpu.vector_store %arg10[%c0_91, %c0_92], %308 {strides = array<i32>} : memref<2x32xf32, #tpu.memory_space<vmem>>, vector<2x32xf32>,
      %c0_93 = arith.constant 0 : index
      %c0_94 = arith.constant 0 : index
      %331 = vector.load %arg11[%c0_93, %c0_94] : memref<2x32xf32, #tpu.memory_space<vmem>>, vector<2x32xf32>
      tpu.vector_store %arg11[%c0_93, %c0_94], %306 {strides = array<i32>} : memref<2x32xf32, #tpu.memory_space<vmem>>, vector<2x32xf32>,
    } else {
    }
    return
  }
  func.func @transform_0(%arg0: i32) -> i32 {
    %c0_i32 = arith.constant 0 : i32
    %c0_i32_0 = arith.constant 0 : i32
    return %c0_i32 : i32
  }
  func.func @transform_1(%arg0: i32) -> (i32, i32) {
    %c0_i32 = arith.constant 0 : i32
    %c0_i32_0 = arith.constant 0 : i32
    %c0_i32_1 = arith.constant 0 : i32
    return %c0_i32, %c0_i32_0 : i32, i32
  }
  func.func @transform_2(%arg0: i32) -> (i32, i32) {
    %c0_i32 = arith.constant 0 : i32
    %c0_i32_0 = arith.constant 0 : i32
    %c0_i32_1 = arith.constant 0 : i32
    return %c0_i32, %c0_i32_0 : i32, i32
  }
  func.func @transform_3(%arg0: i32) -> (i32, i32) {
    %c0_i32 = arith.constant 0 : i32
    %c0_i32_0 = arith.constant 0 : i32
    %c0_i32_1 = arith.constant 0 : i32
    return %c0_i32, %c0_i32_0 : i32, i32
  }
  func.func @transform_4(%arg0: i32) -> (i32, i32) {
    %c0_i32 = arith.constant 0 : i32
    %c0_i32_0 = arith.constant 0 : i32
    %c0_i32_1 = arith.constant 0 : i32
    return %c0_i32, %c0_i32_0 : i32, i32
  }
  func.func @transform_5(%arg0: i32) -> (i32, i32) {
    %c0_i32 = arith.constant 0 : i32
    %c0_i32_0 = arith.constant 0 : i32
    %c0_i32_1 = arith.constant 0 : i32
    return %c0_i32, %c0_i32_0 : i32, i32
  }
  func.func @transform_6(%arg0: i32) -> (i32, i32) {
    %c0_i32 = arith.constant 0 : i32
    %c0_i32_0 = arith.constant 0 : i32
    %c0_i32_1 = arith.constant 0 : i32
    return %c0_i32, %c0_i32_0 : i32, i32
  }
  func.func @transform_7(%arg0: i32) -> (i32, i32) {
    %c0_i32 = arith.constant 0 : i32
    %c0_i32_0 = arith.constant 0 : i32
    %c0_i32_1 = arith.constant 0 : i32
    return %c0_i32, %c0_i32_0 : i32, i32
  }
  func.func @transform_8(%arg0: i32) -> (i32, i32, i32) {
    %c0_i32 = arith.constant 0 : i32
    %c0_i32_0 = arith.constant 0 : i32
    %c0_i32_1 = arith.constant 0 : i32
    return %arg0, %c0_i32, %c0_i32_0 : i32, i32, i32
  }
  func.func @transform_9(%arg0: i32) -> (i32, i32) {
    %c0_i32 = arith.constant 0 : i32
    %c0_i32_0 = arith.constant 0 : i32
    %c0_i32_1 = arith.constant 0 : i32
    return %c0_i32, %c0_i32_0 : i32, i32
  }
  func.func @transform_10(%arg0: i32) -> (i32, i32) {
    %c0_i32 = arith.constant 0 : i32
    %c0_i32_0 = arith.constant 0 : i32
    %c0_i32_1 = arith.constant 0 : i32
    return %c0_i32, %c0_i32_0 : i32, i32
  }
}

</mosaic_0001>

<bundles_post_ra>
// kernel: tpu_custom_call.1
= control target key start
LH: loop header
LB: loop body
LE: loop exit
PB: predicated region body
PF: predicated region fallthrough
CT: control target
= control target key end

     0   :  { %s1873_s0 = inlined_call_operand.vmem [shape: f32[16], index: 0, kind: input, shape index: {}]   ;;  %s1874_s1 = inlined_call_operand.hbm [shape: f32[1,128], index: 1, kind: input, shape index: {}]   ;;  %s1875_s2 = inlined_call_operand.hbm [shape: f32[1,128], index: 2, kind: input, shape index: {}]   ;;  %s1876_s3 = inlined_call_operand.hbm [shape: f32[32,128], index: 3, kind: input, shape index: {}]   ;;  %s1877_s4 = inlined_call_operand.vmem [shape: f32[1,32], index: 4, kind: input, shape index: {}]   ;;  %s1878_s5 = inlined_call_operand.<no memory space> [shape: f32[1,1], index: 5, kind: input, shape index: {}]   ;;  %s1879_s6 = inlined_call_operand.vmem [shape: f32[2,32], index: 6, kind: input, shape index: {}]   ;;  %s1880_s7 = inlined_call_operand.vmem [shape: f32[2,32], index: 7, kind: input, shape index: {}]   ;;  %s1881_s8 = inlined_call_operand.vmem [shape: f32[8,2,1], index: 8, kind: output, shape index: {0}]   ;;  %s1882_s9 = inlined_call_operand.hbm [shape: f32[2,32], index: 9, kind: output, shape index: {1}]   ;;  %s1883_s10 = inlined_call_operand.hbm [shape: f32[2,32], index: 10, kind: output, shape index: {2}]  }
   0x1   :  { %v16_v0 = vstv %s1878_s5 }
   0x2   :  { %17 = vst [vmem:[#allocation5] sm:$0x1] %v16_v0 }
   0x3   :  { %18 = vsyncpa [#allocation9], 0 }
   0x4   :  { %19 = vsyncpa [#allocation7], 0 }
   0x5   :  { %20 = vsyncpa [#allocation12], 0 }
   0x6   :  { %21 = vsyncpa [#allocation8], 0 }
   0x7   :  { %22 = vsyncpa [#allocation16], 0  ;;  %s29_s17 = sshll.u32 %s1873_s0, 4  ;;  %s1546_s18 = smov [#allocation11]   ;;  %s30_s17 = int_to_ptr.vmem [resolvable:$true] %s29_s17 }
   0x8   :  { %s49_s19 = sshll.u32 %s1546_s18, 4  ;;  %s50_s19 = int_to_ptr.vmem [resolvable:$true] %s49_s19 }
   0x9   :  { %s1432_s20 = scalar_lea.vmem %s50_s19, 16  ;;  %s1436_s21 = scalar_lea.vmem %s50_s19, 32 }
   0xa   :  { %p1433_p0 = scmp.ne.s32.totalorder %s50_s19, %s1432_s20  ;;  %p1437_p1 = scmp.lt.s32.totalorder %s50_s19, %s50_s19 }
   0xb   :  { %p1438_p2 = scmp.lt.s32.totalorder %s1436_s21, %s1432_s20 }
   0xd   :  { %p1439_p3 = por %p1438_p2, %p1437_p1 }
   0xf   :  { %p1440_p4 = pnand %p1439_p3, %p1433_p0 }
  0x11   :  { %1443 = shalt.err (!%p1440_p4)
}
  0x12   :  { %52 = dma.hbm_to_vmem [thread:$0]  %s1875_s2, 16, %s50_s19, [#allocation12]  }
  0x13   :  { %s1444_s23 = scalar_lea.vmem %s30_s17, 16  ;;  %p1449_p6 = scmp.lt.s32.totalorder %s30_s17, %s30_s17 }
  0x14   :  { %p1445_p5 = scmp.ne.s32.totalorder %s30_s17, %s1444_s23  ;;  %p1450_p7 = scmp.lt.s32.totalorder %s1444_s23, %s1444_s23 }
  0x16   :  { %p1451_p8 = por %p1450_p7, %p1449_p6 }
  0x18   :  { %p1452_p9 = pnand %p1451_p8, %p1445_p5 }
  0x1a   :  { %1455 = shalt.err (!%p1452_p9)
}
  0x1b   :  { %s1547_s0 = smov [#allocation6]   ;;  %s1548_s24 = smov [#allocation10]  }
  0x1c   :  { %32 = dma.vmem_to_smem %s30_s17, 16, %s1547_s0, [#allocation9]  }
  0x1d   :  { %s39_s25 = sshll.u32 %s1548_s24, 4  ;;  %s1549_s26 = smov [#allocation13]   ;;  %s40_s25 = int_to_ptr.vmem [resolvable:$true] %s39_s25 }
  0x1e   :  { %s58_s27 = sshll.u32 %s1549_s26, 4  ;;  %s1464_s28 = scalar_lea.vmem %s40_s25, 16  ;;  %s59_s27 = int_to_ptr.vmem [resolvable:$true] %s58_s27 }
  0x1f   :  { %p1465_p10 = scmp.ne.s32.totalorder %s40_s25, %s1464_s28  ;;  %s1468_s29 = scalar_lea.vmem %s40_s25, 32 }
  0x20   :  { %p1469_p11 = scmp.lt.s32.totalorder %s40_s25, %s40_s25  ;;  %p1470_p12 = scmp.lt.s32.totalorder %s1468_s29, %s1464_s28 }
  0x22   :  { %p1471_p13 = por %p1470_p12, %p1469_p11 }
  0x24   :  { %p1472_p0 = pnand %p1471_p13, %p1465_p10 }
  0x26   :  { %1475 = shalt.err (!%p1472_p0)
}
  0x27   :  { %42 = dma.hbm_to_vmem [thread:$0]  %s1874_s1, 16, %s40_s25, [#allocation7]  }
  0x28   :  { %s1484_s11 = scalar_lea.vmem %s59_s27, 512  ;;  %p1489_p2 = scmp.lt.s32.totalorder %s59_s27, %s59_s27 }
  0x29   :  { %p1485_p1 = scmp.ne.s32.totalorder %s59_s27, %s1484_s11  ;;  %p1490_p3 = scmp.lt.s32.totalorder %s1484_s11, %s1484_s11 }
  0x2b   :  { %p1491_p4 = por %p1490_p3, %p1489_p2 }
  0x2d   :  { %p1492_p5 = pnand %p1491_p4, %p1485_p1 }
  0x2f   :  { %1495 = shalt.err (!%p1492_p5)
}
  0x30   :  { %s1550_s12 = smov 128   ;;  %s1551_s13 = smov 8  }
  0x31   :  { %64 = dma.hbm_to_vmem [thread:$0]  %s1876_s3, 512, %s59_s27, [#allocation12], %s1550_s12, %s1550_s12, %s1551_s13  }
  0x32   :  { %1536 = dma.done.wait [#allocation9], 16  }
  0x33   :  { %1537 = vsyncadd [#allocation9], 4294967280 }
  0x34   :  { %1538 = dma.done.wait [#allocation7], 16  }
  0x35   :  { %1539 = vsyncadd [#allocation7], 4294967280 }
  0x36   :  { %1540 = dma.done.wait [#allocation12], 528  }
  0x37   :  { %1541 = vsyncadd [#allocation12], 4294966768 }
  0x38   :  { %85 = sfence }
  0x39   :  { %v1629_v1 = vld [vmem:[#allocation13 + $0x18] sm:$0xff]  ;;  %vm91_vm0 = vcmask 254976   ;;  %v1552_v2 = vmov 0.0   ;;  %v1632_v3 = vld [vmem:[#allocation13 + $0x10] sm:$0xff]  ;;  %vm1553_vm1 = vmmov 0   ;;  %v1643_v5 = vld [vmem:[#allocation13 + $0x8] sm:$0xff]  ;;  %v112_v9 = vlaneseq }
  0x3a   :  { %1259 = vmatprep.subr.mxu0 %v1552_v2  ;;  %1267 = vmatprep.mubr.msk.f32.mxu0 %vm1553_vm1, %v1552_v2  ;;  %v90_v4 = vld [vmem:[%s1879_s6] sm:$0x3]  ;;  %vm126_vm2 = vcmask 261120   ;;  %s1185_s17 = sld [smem:[#allocation6 + $0x1]]  ;;  %v1678_v11 = vld [vmem:[#allocation10] sm:$0x1] }
  0x3b   :  { %1260 = vmatpush3.msra.mxu0 %v1629_v1  ;;  %92 = vst.msk [vmem:[#allocation2] sm:$0x3] %vm91_vm0, %v90_v4  ;;  %1270 = vmatprep.subr.mxu1 %v1552_v2  ;;  %v1649_v6 = vld [vmem:[#allocation13] sm:$0xff]  ;;  %s104_s18 = sld [smem:[#allocation6]]  ;;  %v113_v10 = vshrl.u32 %v112_v9, 7  ;;  %vm117_vm3 = vcmask 1040384  }
  0x3c   :  { %1261 = vmatprep.subr.mxu0 %v1552_v2  ;;  %1271 = vmatpush3.msra.mxu1 %v1629_v1  ;;  %v93_v8 = vld [vmem:[%s1880_s7] sm:$0x3]  ;;  %v1685_v18 = vld [vmem:[#allocation11] ss:$0 sm:$0xff]  ;;  %s1554_s7 = smov 64   ;;  %s1555_s19 = smov 32  }
  0x3d   :  { %1262 = vmatpush3.msra.mxu0 %v1632_v3  ;;  %1272 = vmatprep.subr.mxu1 %v1552_v2  ;;  %94 = vst.msk [vmem:[#allocation3] sm:$0x3] %vm91_vm0, %v93_v8  ;;  %v1681_v14 = vsub.s32 0, %v113_v10  ;;  %s1190_s20 = sld [smem:[#allocation6 + $0x3]]  ;;  %vm1136_vm4 = vcmask 1024   ;;  %s1556_s1 = smov 96  }
  0x3e   :  { %1263 = vmatprep.subr.mxu0 %v1552_v2  ;;  %1273 = vmatpush3.msra.mxu1 %v1632_v3  ;;  %s1189_s21 = sld [smem:[#allocation6 + $0x2]]  ;;  %s1557_s16 = smov [#allocation14]  }
  0x3f   :  { %1264 = vmatpush3.msra.mxu0 %v1643_v5  ;;  %1274 = vmatprep.subr.mxu1 %v1552_v2  ;;  %s1194_s5 = sld [smem:[#allocation6 + $0x5]] }
  0x40   :  { %1265 = vmatprep.subr.mxu0 %v1552_v2  ;;  %1275 = vmatpush3.msra.mxu1 %v1643_v5  ;;  %v109_v12 = vstv %s1185_s17  ;;  %s1193_s22 = sld [smem:[#allocation6 + $0x4]]  ;;  %s1158_s17 = sshll.u32 %s1557_s16, 4  ;;  %s1159_s17 = int_to_ptr.vmem [resolvable:$true] %s1158_s17 }
  0x41   :  { %1266 = vmatpush3.msra.mxu0 %v1649_v6  ;;  %1276 = vmatprep.subr.mxu1 %v1552_v2  ;;  %v110_v13 = vmul.f32 %v109_v12, %v1678_v11  ;;  %v105_v15 = vstv %s104_s18  ;;  %s1198_s23 = sld [smem:[#allocation6 + $0x7]]  ;;  %s1496_s18 = scalar_lea.vmem %s1159_s17, 32 }
  0x42   :  { %v102_v7 = vld [vmem:[#allocation2] sm:$0x3]  ;;  %1277 = vmatpush3.msra.mxu1 %v1649_v6  ;;  %1278 = vmatprep.mubr.msk.f32.mxu1 %vm1553_vm1, %v1552_v2  ;;  %v106_v16 = vmul.f32 %v105_v15, %v1678_v11  ;;  %s1197_s0 = sld [smem:[#allocation6 + $0x6]]  ;;  %p1497_p6 = scmp.ne.s32.totalorder %s1159_s17, %s1496_s18 }
  0x43   :  { %1268 = vmatmul.mubr.msk.f32.vlgmr.msra.gmra.mxu0 %vm126_vm2, %v102_v7  ;;  %1281 = vmatprep.subr.mxu0 %v1552_v2  ;;  %v115_v17 = vrot.slane %v110_v13, %v1681_v14  ;;  %v241_v40 = vstv %s1190_s20  ;;  %s1202_s24 = sld [smem:[#allocation6 + $0x9]]  ;;  %p1501_p7 = scmp.lt.s32.totalorder %s1159_s17, %s1159_s17 }
  0x44   :  { %1282 = vmatpush3.msra.mxu0 %v1629_v1  ;;  %1289 = vmatprep.mubr.msk.f32.mxu0 %vm1553_vm1, %v1552_v2  ;;  %v103_v25 = vld [vmem:[#allocation3] sm:$0x3]  ;;  %v242_v41 = vmul.f32 %v241_v40, %v1678_v11  ;;  %v237_v42 = vstv %s1189_s21  ;;  %s1201_s25 = sld [smem:[#allocation6 + $0x8]]  ;;  %p1502_p8 = scmp.lt.s32.totalorder %s1496_s18, %s1496_s18 }
  0x45   :  { %1283 = vmatprep.subr.mxu0 %v1552_v2  ;;  %1292 = vmatprep.subr.mxu1 %v1552_v2  ;;  %v118_v19 = vsel %vm117_vm3, %v106_v16, %v115_v17  ;;  %v238_v43 = vmul.f32 %v237_v42, %v1678_v11  ;;  %v360_v0 = vstv %s1194_s5  ;;  %s1206_s26 = sld [smem:[#allocation6 + $0xb]] }
  0x46   :  { %1284 = vmatpush3.msra.mxu0 %v1632_v3  ;;  %v125_v20 = vadd.f32 %v1685_v18, %v118_v19  ;;  %v247_v44 = vrot.slane %v242_v41, %v1681_v14  ;;  %v361_v4 = vmul.f32 %v360_v0, %v1678_v11  ;;  %v356_v7 = vstv %s1193_s22  ;;  %s1205_s27 = sld [smem:[#allocation6 + $0xa]]  ;;  %p1503_p9 = por %p1502_p8, %p1501_p7 }
  0x47   :  { %1285 = vmatprep.subr.mxu0 %v1552_v2  ;;  %v357_v8 = vmul.f32 %v356_v7, %v1678_v11  ;;  %s1210_s28 = sld [smem:[#allocation6 + $0xd]] }
  0x48   :  { %1286 = vmatpush3.msra.mxu0 %v1643_v5  ;;  %v249_v45 = vsel %vm117_vm3, %v238_v43, %v247_v44  ;;  %v366_v9 = vrot.slane %v361_v4, %v1681_v14  ;;  %s1209_s29 = sld [smem:[#allocation6 + $0xc]]  ;;  %p1504_p10 = pnand %p1503_p9, %p1497_p6 }
  0x49   :  { %1287 = vmatprep.subr.mxu0 %v1552_v2  ;;  %v250_v46 = vadd.f32 %v1685_v18, %v249_v45  ;;  %s1214_s2 = sld [smem:[#allocation6 + $0xf]] }
  0x4a   :  { %1288 = vmatpush3.msra.mxu0 %v1649_v6  ;;  %v368_v10 = vsel %vm117_vm3, %v357_v8, %v366_v9  ;;  %s1213_s30 = sld [smem:[#allocation6 + $0xe]] }
  0x4b   :  { %1303 = vmatprep.subr.mxu0 %v1552_v2  ;;  %v369_v12 = vadd.f32 %v1685_v18, %v368_v10 }
 0x103   :  { %v196_v21 = vpop.f32.mrf.mxu0 }
 0x104   :  { %v200_v22 = vadd.f32 %v196_v21, %v125_v20 }
 0x105   :  { %v1269_v23 = vpop.f32.mrf.mxu0 }
 0x106   :  { %1360 = vtanh.f32 %v200_v22  ;;  %v1188_v26 = vmul.f32 -1.442695, %v200_v22 }
 0x108   :  { %1362 = vpow2.f32 %v1188_v26 }
 0x113   :  { %v1361_v24 = vpop.eup %1360 }
 0x114   :  { %214 = vrot.lane.b32.xlu0 %v1361_v24, %s1554_s7 }
 0x115   :  { %v1363_v27 = vpop.eup %1362 }
 0x116   :  { %v204_v28 = vadd.f32 1.0, %v1363_v27 }
 0x118   :  { %209 = vrot.lane.b32.xlu0 %v103_v25, %s1555_s19  ;;  %1364 = vrcp.f32 %v204_v28 }
 0x125   :  { %v1365_v29 = vpop.eup %1364 }
 0x186   :  { %v215_v30 = vpop.permute.xlu0 %214 }
 0x187   :  { %v217_v31 = vmul.f32 %v1365_v29, %v215_v30 }
 0x189   :  { %219 = vrot.lane.b32.xlu1 %v217_v31, %s1555_s19 }
 0x18a   :  { %v210_v32 = vpop.permute.xlu0 %209 }
 0x18b   :  { %v212_v33 = vmul.f32 %v1365_v29, %v210_v32  ;;  %v479_v32 = vstv %s1198_s23 }
 0x1fb   :  { %v220_v34 = vpop.permute.xlu1 %219 }
 0x1fc   :  { %v222_v35 = vadd.f32 %v220_v34, %v212_v33  ;;  %v480_v33 = vmul.f32 %v479_v32, %v1678_v11  ;;  %v475_v34 = vstv %s1197_s0 }
 0x1fe   :  { %1366 = vtanh.f32 %v222_v35 }
 0x20b   :  { %v1367_v36 = vpop.eup %1366 }
 0x20c   :  { %225 = vrot.lane.b32.xlu1 %v1367_v36, %s1554_s7  ;;  %v485_v36 = vrot.slane %v480_v33, %v1681_v14 }
 0x27e   :  { %v226_v37 = vpop.permute.xlu1 %225 }
 0x27f   :  { %v228_v38 = vmul.f32 %v1365_v29, %v226_v37 }
 0x281   :  { %230 = vrot.lane.b32.xlu0 %v228_v38, %s1555_s19 }
 0x2f3   :  { %v231_v39 = vpop.permute.xlu0 %230 }
 0x2f4   :  { %234 = vst.msk [vmem:[#allocation4] sm:$0x3] %vm91_vm0, %v231_v39  ;;  %1279 = vmatmul.mubr.msk.f32.vlgmr.msra.gmra.mxu1 %vm126_vm2, %v231_v39 }
 0x2f5   :  { %1293 = vmatpush3.msra.mxu1 %v1629_v1  ;;  %1300 = vmatprep.mubr.msk.f32.mxu1 %vm1553_vm1, %v1552_v2 }
 0x2f6   :  { %1294 = vmatprep.subr.mxu1 %v1552_v2 }
 0x2f7   :  { %1295 = vmatpush3.msra.mxu1 %v1632_v3 }
 0x2f8   :  { %1296 = vmatprep.subr.mxu1 %v1552_v2 }
 0x2f9   :  { %1297 = vmatpush3.msra.mxu1 %v1643_v5 }
 0x2fa   :  { %1298 = vmatprep.subr.mxu1 %v1552_v2 }
 0x2fb   :  { %1299 = vmatpush3.msra.mxu1 %v1649_v6 }
 0x2fc   :  { %1314 = vmatprep.subr.mxu1 %v1552_v2 }
 0x3b4   :  { %v319_v47 = vpop.f32.mrf.mxu1 }
 0x3b5   :  { %v323_v48 = vadd.f32 %v319_v47, %v250_v46 }
 0x3b6   :  { %v1280_v49 = vpop.f32.mrf.mxu1 }
 0x3b7   :  { %1368 = vtanh.f32 %v323_v48  ;;  %v1192_v51 = vmul.f32 -1.442695, %v323_v48 }
 0x3b9   :  { %1370 = vpow2.f32 %v1192_v51 }
 0x3c4   :  { %v1369_v50 = vpop.eup %1368 }
 0x3c5   :  { %333 = vrot.lane.b32.xlu1 %v1369_v50, %s1554_s7 }
 0x3c6   :  { %v1371_v52 = vpop.eup %1370 }
 0x3c7   :  { %v327_v53 = vadd.f32 1.0, %v1371_v52 }
 0x3c9   :  { %1372 = vrcp.f32 %v327_v53 }
 0x3d6   :  { %v1373_v54 = vpop.eup %1372 }
 0x3d7   :  { %v331_v57 = vmul.f32 %v1373_v54, %v222_v35  ;;  %v476_v35 = vmul.f32 %v475_v34, %v1678_v11 }
 0x3d9   :  { %v487_v37 = vsel %vm117_vm3, %v476_v35, %v485_v36 }
 0x3da   :  { %v488_v38 = vadd.f32 %v1685_v18, %v487_v37 }
 0x437   :  { %v334_v55 = vpop.permute.xlu1 %333 }
 0x438   :  { %v336_v56 = vmul.f32 %v1373_v54, %v334_v55 }
 0x43a   :  { %338 = vrot.lane.b32.xlu0 %v336_v56, %s1555_s19  ;;  %v598_v56 = vstv %s1202_s24 }
 0x4ac   :  { %v339_v58 = vpop.permute.xlu0 %338 }
 0x4ad   :  { %v341_v59 = vadd.f32 %v339_v58, %v331_v57  ;;  %v599_v57 = vmul.f32 %v598_v56, %v1678_v11  ;;  %v594_v58 = vstv %s1201_s25 }
 0x4af   :  { %1374 = vtanh.f32 %v341_v59 }
 0x4bc   :  { %v1375_v60 = vpop.eup %1374 }
 0x4bd   :  { %344 = vrot.lane.b32.xlu1 %v1375_v60, %s1554_s7  ;;  %v604_v60 = vrot.slane %v599_v57, %v1681_v14 }
 0x52f   :  { %v345_v61 = vpop.permute.xlu1 %344 }
 0x530   :  { %v347_v62 = vmul.f32 %v1373_v54, %v345_v61 }
 0x532   :  { %349 = vrot.lane.b32.xlu0 %v347_v62, %s1555_s19 }
 0x5a4   :  { %v350_v63 = vpop.permute.xlu0 %349 }
 0x5a5   :  { %353 = vst.msk [vmem:[#allocation4 + $0x2] sm:$0x3] %vm91_vm0, %v350_v63  ;;  %1290 = vmatmul.mubr.msk.f32.vlgmr.msra.gmra.mxu0 %vm126_vm2, %v350_v63 }
 0x5a6   :  { %1304 = vmatpush3.msra.mxu0 %v1629_v1  ;;  %1311 = vmatprep.mubr.msk.f32.mxu0 %vm1553_vm1, %v1552_v2 }
 0x5a7   :  { %1305 = vmatprep.subr.mxu0 %v1552_v2 }
 0x5a8   :  { %1306 = vmatpush3.msra.mxu0 %v1632_v3 }
 0x5a9   :  { %1307 = vmatprep.subr.mxu0 %v1552_v2 }
 0x5aa   :  { %1308 = vmatpush3.msra.mxu0 %v1643_v5 }
 0x5ab   :  { %1309 = vmatprep.subr.mxu0 %v1552_v2 }
 0x5ac   :  { %1310 = vmatpush3.msra.mxu0 %v1649_v6 }
 0x5ad   :  { %1325 = vmatprep.subr.mxu0 %v1552_v2 }
 0x665   :  { %v438_v13 = vpop.f32.mrf.mxu0 }
 0x666   :  { %v442_v15 = vadd.f32 %v438_v13, %v369_v12 }
 0x667   :  { %v1291_v16 = vpop.f32.mrf.mxu0 }
 0x668   :  { %1376 = vtanh.f32 %v442_v15  ;;  %v1196_v19 = vmul.f32 -1.442695, %v442_v15 }
 0x66a   :  { %1378 = vpow2.f32 %v1196_v19 }
 0x675   :  { %v1377_v17 = vpop.eup %1376 }
 0x676   :  { %452 = vrot.lane.b32.xlu1 %v1377_v17, %s1554_s7 }
 0x677   :  { %v1379_v20 = vpop.eup %1378 }
 0x678   :  { %v446_v21 = vadd.f32 1.0, %v1379_v20 }
 0x67a   :  { %1380 = vrcp.f32 %v446_v21 }
 0x687   :  { %v1381_v22 = vpop.eup %1380 }
 0x688   :  { %v450_v25 = vmul.f32 %v1381_v22, %v341_v59  ;;  %v595_v59 = vmul.f32 %v594_v58, %v1678_v11 }
 0x68a   :  { %v606_v61 = vsel %vm117_vm3, %v595_v59, %v604_v60 }
 0x68b   :  { %v607_v62 = vadd.f32 %v1685_v18, %v606_v61 }
 0x6e8   :  { %v453_v23 = vpop.permute.xlu1 %452 }
 0x6e9   :  { %v455_v24 = vmul.f32 %v1381_v22, %v453_v23 }
 0x6eb   :  { %457 = vrot.lane.b32.xlu0 %v455_v24, %s1555_s19  ;;  %v717_v24 = vstv %s1206_s26 }
 0x75d   :  { %v458_v26 = vpop.permute.xlu0 %457 }
 0x75e   :  { %v460_v27 = vadd.f32 %v458_v26, %v450_v25  ;;  %v713_v25 = vstv %s1205_s27 }
 0x75f   :  { %v714_v26 = vmul.f32 %v713_v25, %v1678_v11 }
 0x760   :  { %1382 = vtanh.f32 %v460_v27 }
 0x76d   :  { %v1383_v28 = vpop.eup %1382 }
 0x76e   :  { %463 = vrot.lane.b32.xlu1 %v1383_v28, %s1554_s7 }
 0x7e0   :  { %v464_v29 = vpop.permute.xlu1 %463 }
 0x7e1   :  { %v466_v30 = vmul.f32 %v1381_v22, %v464_v29 }
 0x7e3   :  { %468 = vrot.lane.b32.xlu0 %v466_v30, %s1555_s19 }
 0x855   :  { %v469_v31 = vpop.permute.xlu0 %468 }
 0x856   :  { %472 = vst.msk [vmem:[#allocation4 + $0x4] sm:$0x3] %vm91_vm0, %v469_v31  ;;  %1301 = vmatmul.mubr.msk.f32.vlgmr.msra.gmra.mxu1 %vm126_vm2, %v469_v31 }
 0x857   :  { %1315 = vmatpush3.msra.mxu1 %v1629_v1  ;;  %1322 = vmatprep.mubr.msk.f32.mxu1 %vm1553_vm1, %v1552_v2 }
 0x858   :  { %1316 = vmatprep.subr.mxu1 %v1552_v2 }
 0x859   :  { %1317 = vmatpush3.msra.mxu1 %v1632_v3 }
 0x85a   :  { %1318 = vmatprep.subr.mxu1 %v1552_v2 }
 0x85b   :  { %1319 = vmatpush3.msra.mxu1 %v1643_v5 }
 0x85c   :  { %1320 = vmatprep.subr.mxu1 %v1552_v2 }
 0x85d   :  { %1321 = vmatpush3.msra.mxu1 %v1649_v6 }
 0x85e   :  { %1336 = vmatprep.subr.mxu1 %v1552_v2 }
 0x916   :  { %v557_v39 = vpop.f32.mrf.mxu1 }
 0x917   :  { %v561_v40 = vadd.f32 %v557_v39, %v488_v38 }
 0x918   :  { %v1302_v41 = vpop.f32.mrf.mxu1 }
 0x919   :  { %1384 = vtanh.f32 %v561_v40  ;;  %v1200_v43 = vmul.f32 -1.442695, %v561_v40 }
 0x91b   :  { %1386 = vpow2.f32 %v1200_v43  ;;  %v836_v43 = vstv %s1210_s28 }
 0x926   :  { %v1385_v42 = vpop.eup %1384 }
 0x927   :  { %571 = vrot.lane.b32.xlu1 %v1385_v42, %s1554_s7 }
 0x928   :  { %v1387_v44 = vpop.eup %1386 }
 0x929   :  { %v565_v45 = vadd.f32 1.0, %v1387_v44  ;;  %v837_v44 = vmul.f32 %v836_v43, %v1678_v11 }
 0x92b   :  { %1388 = vrcp.f32 %v565_v45  ;;  %v832_v45 = vstv %s1209_s29 }
 0x938   :  { %v1389_v46 = vpop.eup %1388 }
 0x939   :  { %v569_v49 = vmul.f32 %v1389_v46, %v460_v27 }
 0x999   :  { %v572_v47 = vpop.permute.xlu1 %571 }
 0x99a   :  { %v574_v48 = vmul.f32 %v1389_v46, %v572_v47  ;;  %v842_v47 = vrot.slane %v837_v44, %v1681_v14 }
 0x99c   :  { %576 = vrot.lane.b32.xlu0 %v574_v48, %s1555_s19 }
 0xa0e   :  { %v577_v50 = vpop.permute.xlu0 %576 }
 0xa0f   :  { %v579_v51 = vadd.f32 %v577_v50, %v569_v49 }
 0xa11   :  { %1390 = vtanh.f32 %v579_v51 }
 0xa1e   :  { %v1391_v52 = vpop.eup %1390 }
 0xa1f   :  { %582 = vrot.lane.b32.xlu1 %v1391_v52, %s1554_s7 }
 0xa91   :  { %v583_v53 = vpop.permute.xlu1 %582 }
 0xa92   :  { %v585_v54 = vmul.f32 %v1389_v46, %v583_v53  ;;  %v833_v46 = vmul.f32 %v832_v45, %v1678_v11 }
 0xa94   :  { %587 = vrot.lane.b32.xlu0 %v585_v54, %s1555_s19  ;;  %v844_v48 = vsel %vm117_vm3, %v833_v46, %v842_v47 }
 0xa95   :  { %v845_v49 = vadd.f32 %v1685_v18, %v844_v48  ;;  %v1218_v48 = vld [vmem:[#allocation5] ss:$0 sm:$0xff] }
 0xb06   :  { %v588_v55 = vpop.permute.xlu0 %587 }
 0xb07   :  { %591 = vst.msk [vmem:[#allocation4 + $0x6] sm:$0x3] %vm91_vm0, %v588_v55  ;;  %1312 = vmatmul.mubr.msk.f32.vlgmr.msra.gmra.mxu0 %vm126_vm2, %v588_v55 }
 0xb08   :  { %1326 = vmatpush3.msra.mxu0 %v1629_v1  ;;  %1333 = vmatprep.mubr.msk.f32.mxu0 %vm1553_vm1, %v1552_v2 }
 0xb09   :  { %1327 = vmatprep.subr.mxu0 %v1552_v2 }
 0xb0a   :  { %1328 = vmatpush3.msra.mxu0 %v1632_v3 }
 0xb0b   :  { %1329 = vmatprep.subr.mxu0 %v1552_v2 }
 0xb0c   :  { %1330 = vmatpush3.msra.mxu0 %v1643_v5 }
 0xb0d   :  { %1331 = vmatprep.subr.mxu0 %v1552_v2 }
 0xb0e   :  { %1332 = vmatpush3.msra.mxu0 %v1649_v6 }
 0xbc7   :  { %v676_v63 = vpop.f32.mrf.mxu0 }
 0xbc8   :  { %v680_v0 = vadd.f32 %v676_v63, %v607_v62 }
 0xbc9   :  { %v1313_v4 = vpop.f32.mrf.mxu0 }
 0xbca   :  { %1392 = vtanh.f32 %v680_v0  ;;  %v1204_v8 = vmul.f32 -1.442695, %v680_v0 }
 0xbcc   :  { %1394 = vpow2.f32 %v1204_v8  ;;  %v955_v8 = vstv %s1214_s2 }
 0xbd7   :  { %v1393_v7 = vpop.eup %1392 }
 0xbd8   :  { %690 = vrot.lane.b32.xlu1 %v1393_v7, %s1554_s7 }
 0xbd9   :  { %v1395_v9 = vpop.eup %1394 }
 0xbda   :  { %v684_v10 = vadd.f32 1.0, %v1395_v9  ;;  %v956_v9 = vmul.f32 %v955_v8, %v1678_v11 }
 0xbdc   :  { %1396 = vrcp.f32 %v684_v10  ;;  %v951_v10 = vstv %s1213_s30 }
 0xbe9   :  { %v1397_v12 = vpop.eup %1396 }
 0xbea   :  { %v688_v16 = vmul.f32 %v1397_v12, %v579_v51 }
 0xc4a   :  { %v691_v13 = vpop.permute.xlu1 %690 }
 0xc4b   :  { %v693_v15 = vmul.f32 %v1397_v12, %v691_v13  ;;  %v961_v13 = vrot.slane %v956_v9, %v1681_v14 }
 0xc4d   :  { %695 = vrot.lane.b32.xlu0 %v693_v15, %s1555_s19 }
 0xcbf   :  { %v696_v17 = vpop.permute.xlu0 %695 }
 0xcc0   :  { %v698_v19 = vadd.f32 %v696_v17, %v688_v16 }
 0xcc2   :  { %1398 = vtanh.f32 %v698_v19 }
 0xccf   :  { %v1399_v20 = vpop.eup %1398 }
 0xcd0   :  { %701 = vrot.lane.b32.xlu1 %v1399_v20, %s1554_s7 }
 0xd42   :  { %v702_v21 = vpop.permute.xlu1 %701 }
 0xd43   :  { %v704_v22 = vmul.f32 %v1397_v12, %v702_v21  ;;  %v952_v12 = vmul.f32 %v951_v10, %v1678_v11 }
 0xd45   :  { %706 = vrot.lane.b32.xlu0 %v704_v22, %s1555_s19  ;;  %v963_v15 = vsel %vm117_vm3, %v952_v12, %v961_v13 }
 0xd46   :  { %v964_v16 = vadd.f32 %v1685_v18, %v963_v15 }
 0xdb7   :  { %v707_v23 = vpop.permute.xlu0 %706 }
 0xdb8   :  { %710 = vst.msk [vmem:[#allocation4 + $0x8] sm:$0x3] %vm91_vm0, %v707_v23  ;;  %1323 = vmatmul.mubr.msk.f32.vlgmr.msra.gmra.mxu1 %vm126_vm2, %v707_v23 }
 0xdb9   :  { %1337 = vmatpush3.msra.mxu1 %v1629_v1  ;;  %1344 = vmatprep.mubr.msk.f32.mxu1 %vm1553_vm1, %v1552_v2  ;;  %v718_v1 = vmul.f32 %v717_v24, %v1678_v11 }
 0xdba   :  { %1338 = vmatprep.subr.mxu1 %v1552_v2 }
 0xdbb   :  { %1339 = vmatpush3.msra.mxu1 %v1632_v3  ;;  %v723_v27 = vrot.slane %v718_v1, %v1681_v14 }
 0xdbc   :  { %1340 = vmatprep.subr.mxu1 %v1552_v2 }
 0xdbd   :  { %1341 = vmatpush3.msra.mxu1 %v1643_v5  ;;  %v725_v3 = vsel %vm117_vm3, %v714_v26, %v723_v27 }
 0xdbe   :  { %1342 = vmatprep.subr.mxu1 %v1552_v2  ;;  %v726_v28 = vadd.f32 %v1685_v18, %v725_v3  ;;  %v1074_v3 = vld [vmem:[#allocation4] sm:$0x3] }
 0xdbf   :  { %1343 = vmatpush3.msra.mxu1 %v1649_v6 }
 0xe78   :  { %v795_v29 = vpop.f32.mrf.mxu1 }
 0xe79   :  { %v799_v5 = vadd.f32 %v795_v29, %v726_v28  ;;  %v1217_v28 = vld [vmem:[%s1877_s4] ss:$0 sm:$0xff] }
 0xe7a   :  { %v1324_v30 = vpop.f32.mrf.mxu1  ;;  %v1089_v29 = vmul.f32 %v1217_v28, %v1074_v3 }
 0xe7b   :  { %1400 = vtanh.f32 %v799_v5  ;;  %v1208_v6 = vmul.f32 -1.442695, %v799_v5  ;;  %v1077_v5 = vld [vmem:[#allocation4 + $0x6] sm:$0x3] }
 0xe7c   :  { %v1097_v30 = vsel %vm91_vm0, %v1089_v29, 0.0 }
 0xe7d   :  { %1402 = vpow2.f32 %v1208_v6 }
 0xe88   :  { %v1401_v2 = vpop.eup %1400 }
 0xe89   :  { %809 = vrot.lane.b32.xlu1 %v1401_v2, %s1554_s7  ;;  %v1092_v2 = vmul.f32 %v1217_v28, %v1077_v5 }
 0xe8a   :  { %v1403_v31 = vpop.eup %1402 }
 0xe8b   :  { %v803_v32 = vadd.f32 1.0, %v1403_v31  ;;  %v1106_v31 = vsel %vm91_vm0, %v1092_v2, 0.0 }
 0xe8d   :  { %1404 = vrcp.f32 %v803_v32 }
 0xe9a   :  { %v1405_v33 = vpop.eup %1404 }
 0xe9b   :  { %v807_v36 = vmul.f32 %v1405_v33, %v698_v19 }
 0xefb   :  { %v810_v34 = vpop.permute.xlu1 %809 }
 0xefc   :  { %v812_v35 = vmul.f32 %v1405_v33, %v810_v34 }
 0xefe   :  { %814 = vrot.lane.b32.xlu0 %v812_v35, %s1555_s19 }
 0xf70   :  { %v815_v37 = vpop.permute.xlu0 %814 }
 0xf71   :  { %v817_v38 = vadd.f32 %v815_v37, %v807_v36  ;;  %v1075_v36 = vld [vmem:[#allocation4 + $0x2] sm:$0x3] }
 0xf72   :  { %v1090_v37 = vmul.f32 %v1217_v28, %v1075_v36 }
 0xf73   :  { %1406 = vtanh.f32 %v817_v38 }
 0xf80   :  { %v1407_v39 = vpop.eup %1406 }
 0xf81   :  { %820 = vrot.lane.b32.xlu1 %v1407_v39, %s1554_s7  ;;  %v1100_v39 = vsel %vm91_vm0, %v1090_v37, 0.0 }
 0xff3   :  { %v821_v40 = vpop.permute.xlu1 %820 }
 0xff4   :  { %v823_v41 = vmul.f32 %v1405_v33, %v821_v40 }
 0xff6   :  { %825 = vrot.lane.b32.xlu0 %v823_v41, %s1555_s19  ;;  %v1078_v41 = vld [vmem:[#allocation4 + $0x8] sm:$0x3] }
 0xff7   :  { %v1093_v43 = vmul.f32 %v1217_v28, %v1078_v41 }
 0xff9   :  { %v1109_v45 = vsel %vm91_vm0, %v1093_v43, 0.0 }
0x1068   :  { %v826_v42 = vpop.permute.xlu0 %825 }
0x1069   :  { %829 = vst.msk [vmem:[#allocation4 + $0xa] sm:$0x3] %vm91_vm0, %v826_v42  ;;  %1334 = vmatmul.mubr.msk.f32.vlgmr.msra.gmra.mxu0 %vm126_vm2, %v826_v42 }
0x1070   :  { %v1079_v6 = vld [vmem:[#allocation4 + $0xa] sm:$0x3] }
0x1071   :  { %v1094_v32 = vmul.f32 %v1217_v28, %v1079_v6 }
0x1073   :  { %v1112_v33 = vsel %vm91_vm0, %v1094_v32, 0.0 }
0x1129   :  { %v914_v50 = vpop.f32.mrf.mxu0 }
0x112a   :  { %v918_v51 = vadd.f32 %v914_v50, %v845_v49 }
0x112b   :  { %v1335_v52 = vpop.f32.mrf.mxu0 }
0x112c   :  { %1408 = vtanh.f32 %v918_v51  ;;  %v1212_v54 = vmul.f32 -1.442695, %v918_v51 }
0x112e   :  { %1410 = vpow2.f32 %v1212_v54 }
0x1139   :  { %v1409_v53 = vpop.eup %1408 }
0x113a   :  { %928 = vrot.lane.b32.xlu1 %v1409_v53, %s1554_s7 }
0x113b   :  { %v1411_v55 = vpop.eup %1410 }
0x113c   :  { %v922_v56 = vadd.f32 1.0, %v1411_v55 }
0x113e   :  { %1412 = vrcp.f32 %v922_v56 }
0x114b   :  { %v1413_v57 = vpop.eup %1412 }
0x114c   :  { %v926_v60 = vmul.f32 %v1413_v57, %v817_v38  ;;  %v1076_v38 = vld [vmem:[#allocation4 + $0x4] sm:$0x3] }
0x114d   :  { %v1091_v40 = vmul.f32 %v1217_v28, %v1076_v38 }
0x114f   :  { %v1103_v42 = vsel %vm91_vm0, %v1091_v40, 0.0 }
0x11ac   :  { %v929_v58 = vpop.permute.xlu1 %928 }
0x11ad   :  { %v931_v59 = vmul.f32 %v1413_v57, %v929_v58 }
0x11af   :  { %933 = vrot.lane.b32.xlu0 %v931_v59, %s1555_s19 }
0x1221   :  { %v934_v61 = vpop.permute.xlu0 %933 }
0x1222   :  { %v936_v62 = vadd.f32 %v934_v61, %v926_v60 }
0x1224   :  { %1414 = vtanh.f32 %v936_v62 }
0x1231   :  { %v1415_v63 = vpop.eup %1414 }
0x1232   :  { %939 = vrot.lane.b32.xlu1 %v1415_v63, %s1554_s7 }
0x12a4   :  { %v940_v0 = vpop.permute.xlu1 %939 }
0x12a5   :  { %v942_v4 = vmul.f32 %v1413_v57, %v940_v0 }
0x12a7   :  { %944 = vrot.lane.b32.xlu0 %v942_v4, %s1555_s19 }
0x1319   :  { %v945_v7 = vpop.permute.xlu0 %944 }
0x131a   :  { %948 = vst.msk [vmem:[#allocation4 + $0xc] sm:$0x3] %vm91_vm0, %v945_v7  ;;  %1345 = vmatmul.mubr.msk.f32.vlgmr.msra.gmra.mxu1 %vm126_vm2, %v945_v7 }
0x1321   :  { %v1080_v44 = vld [vmem:[#allocation4 + $0xc] sm:$0x3] }
0x1322   :  { %v1095_v46 = vmul.f32 %v1217_v28, %v1080_v44 }
0x1324   :  { %v1115_v47 = vsel %vm91_vm0, %v1095_v46, 0.0 }
0x13da   :  { %v1033_v17 = vpop.f32.mrf.mxu1 }
0x13db   :  { %v1037_v19 = vadd.f32 %v1033_v17, %v964_v16 }
0x13dc   :  { %v1346_v20 = vpop.f32.mrf.mxu1 }
0x13dd   :  { %1416 = vtanh.f32 %v1037_v19  ;;  %v1216_v22 = vmul.f32 -1.442695, %v1037_v19 }
0x13df   :  { %1418 = vpow2.f32 %v1216_v22 }
0x13ea   :  { %v1417_v21 = vpop.eup %1416 }
0x13eb   :  { %1047 = vrot.lane.b32.xlu1 %v1417_v21, %s1554_s7 }
0x13ec   :  { %v1419_v23 = vpop.eup %1418 }
0x13ed   :  { %v1041_v24 = vadd.f32 1.0, %v1419_v23 }
0x13ef   :  { %1420 = vrcp.f32 %v1041_v24 }
0x13fc   :  { %v1421_v1 = vpop.eup %1420 }
0x13fd   :  { %v1045_v14 = vmul.f32 %v1421_v1, %v936_v62 }
0x145d   :  { %v1048_v11 = vpop.permute.xlu1 %1047 }
0x145e   :  { %v1050_v25 = vmul.f32 %v1421_v1, %v1048_v11 }
0x1460   :  { %1052 = vrot.lane.b32.xlu0 %v1050_v25, %s1555_s19 }
0x14d2   :  { %v1053_v26 = vpop.permute.xlu0 %1052 }
0x14d3   :  { %v1055_v18 = vadd.f32 %v1053_v26, %v1045_v14 }
0x14d5   :  { %1422 = vtanh.f32 %v1055_v18 }
0x14e2   :  { %v1423_v27 = vpop.eup %1422 }
0x14e3   :  { %1058 = vrot.lane.b32.xlu1 %v1423_v27, %s1554_s7 }
0x1507   :  { %1098 = vadd.xlane.f32.xlu1 %v1097_v30 }
0x150b   :  { %1107 = vadd.xlane.f32.xlu1 %v1106_v31 }
0x150f   :  { %1113 = vadd.xlane.f32.xlu1 %v1112_v33 }
0x1555   :  { %v1059_v34 = vpop.permute.xlu1 %1058 }
0x1556   :  { %v1061_v35 = vmul.f32 %v1421_v1, %v1059_v34 }
0x1558   :  { %1063 = vrot.lane.b32.xlu0 %v1061_v35, %s1555_s19 }
0x1577   :  { %1101 = vadd.xlane.f32.xlu0 %v1100_v39 }
0x157b   :  { %1104 = vadd.xlane.f32.xlu0 %v1103_v42 }
0x157f   :  { %1110 = vadd.xlane.f32.xlu0 %v1109_v45 }
0x1583   :  { %1116 = vadd.xlane.f32.xlu0 %v1115_v47 }
0x1590   :  { %v1099_v49 = vpop.xlane.xlu1 %1098 }
0x1591   :  { %v1128_v50 = vadd.f32 %v1218_v48, %v1099_v49 }
0x1593   :  { %1137 = vst.msk [vmem:[%s1881_s8] sm:$0x3] %vm1136_vm4, %v1128_v50 }
0x1594   :  { %v1108_v51 = vpop.xlane.xlu1 %1107 }
0x1595   :  { %v1131_v52 = vadd.f32 %v1218_v48, %v1108_v51 }
0x1597   :  { %1140 = vst.msk [vmem:[%s1881_s8 + $0x6] sm:$0x3] %vm1136_vm4, %v1131_v52 }
0x1598   :  { %v1114_v53 = vpop.xlane.xlu1 %1113 }
0x1599   :  { %v1133_v54 = vadd.f32 %v1218_v48, %v1114_v53  ;;  %1070 = vrot.lane.b32.xlu0 %v1055_v18, %s1556_s1 }
0x159b   :  { %1142 = vst.msk [vmem:[%s1881_s8 + $0xa] sm:$0x3] %vm1136_vm4, %v1133_v54 }
0x15ca   :  { %v1064_v55 = vpop.permute.xlu0 %1063 }
0x15cb   :  { %1067 = vst.msk [vmem:[#allocation4 + $0xe] sm:$0x3] %vm91_vm0, %v1064_v55  ;;  %1068 = vst.msk [vmem:[#allocation2] sm:$0x3] %vm91_vm0, %v1064_v55 }
0x15cc   :  { %1148 = vst.msk [vmem:[#allocation14] sm:$0x3] %vm91_vm0, %v1064_v55 }
0x15d2   :  { %v1081_v56 = vld [vmem:[#allocation4 + $0xe] sm:$0x3] }
0x15d3   :  { %v1096_v57 = vmul.f32 %v1217_v28, %v1081_v56 }
0x15d5   :  { %v1118_v58 = vsel %vm91_vm0, %v1096_v57, 0.0 }
0x15d6   :  { %1119 = vadd.xlane.f32.xlu1 %v1118_v58 }
0x15d7   :  { %1507 = shalt.err (!%p1504_p10)
}
0x15d8   :  { %1161 = dma.vmem_to_hbm [thread:$0]  %s1159_s17, 32, %s1882_s9, [#allocation8]  }
0x15d9   :  { %s1558_s9 = smov [#allocation15]  }
0x15da   :  { %s1168_s24 = sshll.u32 %s1558_s9, 4  ;;  %s1169_s24 = int_to_ptr.vmem [resolvable:$true] %s1168_s24 }
0x15db   :  { %s1516_s27 = scalar_lea.vmem %s1169_s24, 32  ;;  %p1521_p12 = scmp.lt.s32.totalorder %s1169_s24, %s1169_s24 }
0x15dc   :  { %p1517_p11 = scmp.ne.s32.totalorder %s1169_s24, %s1516_s27  ;;  %p1522_p13 = scmp.lt.s32.totalorder %s1516_s27, %s1516_s27 }
0x15de   :  { %p1523_p0 = por %p1522_p13, %p1521_p12 }
0x15e0   :  { %p1524_p1 = pnand %p1523_p0, %p1517_p11 }
0x1600   :  { %v1102_v59 = vpop.xlane.xlu0 %1101 }
0x1601   :  { %v1129_v60 = vadd.f32 %v1218_v48, %v1102_v59 }
0x1603   :  { %1138 = vst.msk [vmem:[%s1881_s8 + $0x2] sm:$0x3] %vm1136_vm4, %v1129_v60 }
0x1604   :  { %v1105_v61 = vpop.xlane.xlu0 %1104 }
0x1605   :  { %v1130_v62 = vadd.f32 %v1218_v48, %v1105_v61 }
0x1607   :  { %1139 = vst.msk [vmem:[%s1881_s8 + $0x4] sm:$0x3] %vm1136_vm4, %v1130_v62 }
0x1608   :  { %v1111_v63 = vpop.xlane.xlu0 %1110 }
0x1609   :  { %v1132_v0 = vadd.f32 %v1218_v48, %v1111_v63 }
0x160b   :  { %1141 = vst.msk [vmem:[%s1881_s8 + $0x8] sm:$0x3] %vm1136_vm4, %v1132_v0 }
0x160c   :  { %v1117_v4 = vpop.xlane.xlu0 %1116 }
0x160d   :  { %v1134_v7 = vadd.f32 %v1218_v48, %v1117_v4 }
0x160f   :  { %1143 = vst.msk [vmem:[%s1881_s8 + $0xc] sm:$0x3] %vm1136_vm4, %v1134_v7 }
0x1610   :  { %v1071_v8 = vpop.permute.xlu0 %1070 }
0x1611   :  { %1073 = vst.msk [vmem:[#allocation3] sm:$0x3] %vm91_vm0, %v1071_v8  ;;  %1149 = vst.msk [vmem:[#allocation15] sm:$0x3] %vm91_vm0, %v1071_v8 }
0x1612   :  { %1527 = shalt.err (!%p1524_p1)
}
0x1613   :  { %1171 = dma.vmem_to_hbm [thread:$0]  %s1169_s24, 32, %s1883_s10, [#allocation16]  }
0x165f   :  { %v1120_v9 = vpop.xlane.xlu1 %1119 }
0x1660   :  { %v1135_v10 = vadd.f32 %v1218_v48, %v1120_v9 }
0x1662   :  { %1144 = vst.msk [vmem:[%s1881_s8 + $0xe] sm:$0x3] %vm1136_vm4, %v1135_v10 }
0x1663   :  { %1542 = dma.done.wait [#allocation8], 32  }
0x1664   :  { %1543 = vsyncadd [#allocation8], 4294967264 }
0x1665   :  { %1544 = dma.done.wait [#allocation16], 32  }
0x1666   :  { %1545 = vsyncadd [#allocation16], 4294967264 }
0x1667   :  { %1180 = vsyncpa [#allocation7], 1 }
0x1668   :  { %1181 = vsyncpa [#allocation12], 1 }
0x1669   :  { %1182 = vsyncpa [#allocation8], 1 }
0x166a   :  { %1183 = vsyncpa [#allocation16], 1 }
0x166b   :  { %1184 = vsyncpa [#allocation9], 1 }

</bundles_post_ra>
